<compile_context>
chip_gen: v7x
topology: tpu7x:2x2x1
jax: 0.10.0
libtpu: 0.0.40
codegen_flags: <defaults>
</compile_context>

<pallas_src>
import functools
import math

import jax
import jax.numpy as jnp
from jax.experimental import pallas as pl
from jax.experimental.pallas import tpu as pltpu

# ----- small synthetic model config (shapes implied by a LoRA decoder) -----
VOCAB = 256
D_MODEL = 128
N_HEADS = 4
HEAD_DIM = D_MODEL // N_HEADS        # 32
N_LAYERS = 2
D_MLP = 256
LORA_RANK = 8
LORA_ALPHA = 16.0
LORA_SCALING = LORA_ALPHA / LORA_RANK
RMS_EPS = 1e-6
ROPE_BASE = 10000.0

BF16 = jnp.bfloat16
F32 = jnp.float32

assert D_MODEL == N_HEADS * HEAD_DIM


def _matT(x, w):
    """x: [M, K], w: [N, K] -> [M, N] f32; contraction on last axes (y = x @ w.T)."""
    return jax.lax.dot_general(
        x, w, (((1,), (1,)), ((), ())), preferred_element_type=jnp.float32)


def _rmsnorm(x, gamma, eps):
    var = jnp.mean(x * x, axis=-1, keepdims=True)
    return x * jax.lax.rsqrt(var + eps) * gamma


# -------------------------- Pallas kernels --------------------------
def _fused_qkv_kernel(x_ref, g_ref, wqkv_ref, a_ref, b_ref, cos_ref, sin_ref,
                      rot_ref, q_ref, k_ref, v_ref, *, eps, scaling, d):
    """RMSNorm -> stacked QKV projection -> LoRA(q,v) -> RoPE(q,k), bf16 out.

    One N=3D matmul for the base projection, one [M,2r] LoRA down-projection
    and one [2r,2D] block-diagonal LoRA up-projection; all slices of the wide
    results land on 128-aligned lane offsets.
    """
    x = x_ref[...]                                          # [M, D] f32
    hb = _rmsnorm(x, g_ref[...], eps).astype(BF16)          # [M, D] bf16

    qkv = _matT(hb, wqkv_ref[...])                          # [M, 3D] f32
    ax = _matT(hb, a_ref[...]).astype(BF16)                 # [M, 2r]  (single A matmul)
    lora = jnp.dot(ax, b_ref[...],
                   preferred_element_type=jnp.float32)      # [M, 2D]  (q | v)

    q = qkv[:, :d] + scaling * lora[:, :d]
    k = qkv[:, d:2 * d]
    v = qkv[:, 2 * d:] + scaling * lora[:, d:]

    # Rotate-half RoPE on the packed [M, H*Dh] layout.  The rotation is a
    # cross-lane shuffle with shift Dh/2 inside each head block; we express it
    # as q @ R with a constant +-1 permutation matrix (MXU has plenty of slack
    # here).  At real Dh=128 replace with pltpu.roll(x, Dh//2, axis=-1) (XLU).
    cos = cos_ref[...]
    sin = sin_ref[...]
    rot = rot_ref[...]
    q_ref[...] = (q * cos + jnp.dot(q, rot, preferred_element_type=jnp.float32)
                  * sin).astype(BF16)
    k_ref[...] = (k * cos + jnp.dot(k, rot, preferred_element_type=jnp.float32)
                  * sin).astype(BF16)
    v_ref[...] = v.astype(BF16)


def fused_qkv(x, gamma, wqkv, lora_a, lora_b, cos2d, sin2d, rot):
    m, d = x.shape
    out = jax.ShapeDtypeStruct((m, d), BF16)
    return pl.pallas_call(
        functools.partial(_fused_qkv_kernel, eps=RMS_EPS, scaling=LORA_SCALING, d=d),
        out_shape=(out, out, out),
    )(x, gamma, wqkv, lora_a, lora_b, cos2d, sin2d, rot)


def _attn_kernel(q_ref, k_ref, v_ref, wo_ref, x_ref, o_ref, attn_scr,
                 *, n_heads, dh, scale):
    """Whole-batch multi-head attention + W_o projection + residual add.

    No grid: at these sizes per-step pipeline overhead would dominate, so the
    entire [B, S, D] batch is handled in one invocation.  Per-head outputs are
    lane-packed into a [M, D] VMEM scratch so the output projection runs as a
    single K=128 matmul (no serial per-head accumulate chain).
    """
    b, s, _ = q_ref.shape
    m = b * s
    # Causal mask generated in-register (no [S,S] mask DMA).
    # NOTE: at S=8 the score lane axis is only 8 wide (inherent to the toy
    # shape); a KV tile >=128 keys fixes the lane occupancy at real sizes.
    row = jax.lax.broadcasted_iota(jnp.int32, (b, s, s), 1)
    col = jax.lax.broadcasted_iota(jnp.int32, (b, s, s), 2)
    causal = col <= row

    for h in range(n_heads):            # heads are independent: no MXU serial chain
        lo, hi = h * dh, (h + 1) * dh
        qh = q_ref[:, :, lo:hi]                               # [B, S, Dh] bf16
        kh = k_ref[:, :, lo:hi]
        vh = v_ref[:, :, lo:hi]
        sc = jnp.einsum('bqd,bkd->bqk', qh, kh,
                        preferred_element_type=jnp.float32) * scale
        sc = jnp.where(causal, sc, -1e30)
        mx = jnp.max(sc, axis=-1, keepdims=True)
        p = jnp.exp(sc - mx)
        denom = jnp.sum(p, axis=-1, keepdims=True)
        p = p * pl.reciprocal(denom, approx=True)
        oh = jnp.einsum('bqk,bkd->bqd', p.astype(BF16), vh,
                        preferred_element_type=jnp.float32)   # [B, S, Dh] f32
        # Lane-pack head h so the projection below is ONE [M,128]x[128,128] matmul.
        attn_scr[:, lo:hi] = oh.reshape(m, dh).astype(BF16)

    # Single full-width output projection, fused with the residual add.
    o_ref[...] = x_ref[...] + _matT(attn_scr[...], wo_ref[...])


def attention_block(q3, k3, v3, wo, x2d):
    # q3/k3/v3: [B, S, D] bf16 (packed heads); wo: [D, D] bf16; x2d: [B*S, D] f32
    b, s, d = q3.shape
    m, _ = x2d.shape
    return pl.pallas_call(
        functools.partial(_attn_kernel, n_heads=N_HEADS, dh=HEAD_DIM,
                          scale=1.0 / math.sqrt(HEAD_DIM)),
        out_shape=jax.ShapeDtypeStruct((m, d), F32),
        scratch_shapes=[pltpu.VMEM((m, d), BF16)],
    )(q3, k3, v3, wo, x2d)


def _mlp_kernel(x_ref, g_ref, w13_ref, w2_ref, o_ref, *, eps, d_mlp):
    """RMSNorm -> SwiGLU MLP (stacked gate/up weight) -> residual add."""
    x = x_ref[...]                                          # [M, D] f32
    hb = _rmsnorm(x, g_ref[...], eps).astype(BF16)
    h13 = _matT(hb, w13_ref[...])                           # [M, 2*D_MLP] f32
    act = (jax.nn.silu(h13[:, :d_mlp]) * h13[:, d_mlp:]).astype(BF16)
    o_ref[...] = x + _matT(act, w2_ref[...])


def mlp_block(x, gamma, w13, w2):
    m, d = x.shape
    return pl.pallas_call(
        functools.partial(_mlp_kernel, eps=RMS_EPS, d_mlp=D_MLP),
        out_shape=jax.ShapeDtypeStruct((m, d), F32),
    )(x, gamma, w13, w2)


def _head_kernel(x_ref, g_ref, w_ref, o_ref, hb_ref, *, eps):
    # RMSNorm is computed exactly once (first vocab tile) into a VMEM scratch
    # and reused by every subsequent tile -> each tile is a pure MXU matmul.
    @pl.when(pl.program_id(0) == 0)
    def _():
        hb_ref[...] = _rmsnorm(x_ref[...], g_ref[...], eps).astype(BF16)
    o_ref[...] = _matT(hb_ref[...], w_ref[...])


def lm_head(x, gamma, w_out, *, tn=128):
    m, d = x.shape
    vocab = w_out.shape[0]
    assert vocab % tn == 0, "vocab head tile must divide the vocab size"
    return pl.pallas_call(
        functools.partial(_head_kernel, eps=RMS_EPS),
        out_shape=jax.ShapeDtypeStruct((m, vocab), F32),
        grid=(pl.cdiv(vocab, tn),),
        in_specs=[
            pl.BlockSpec((m, d), lambda j: (0, 0)),
            pl.BlockSpec((1, d), lambda j: (0, 0)),
            pl.BlockSpec((tn, d), lambda j: (j, 0)),
        ],
        out_specs=pl.BlockSpec((m, tn), lambda j: (0, j)),
        scratch_shapes=[pltpu.VMEM((m, d), BF16)],
        # "arbitrary": vocab axis is sequential so the j==0 init is valid and
        # the normalized scratch is reused across tiles.
        compiler_params=pltpu.CompilerParams(
            dimension_semantics=("arbitrary",)),
    )(x, gamma, w_out)


# ------------------------------ glue ------------------------------
def rope_tables_2d(input_pos):
    """Rotate-half RoPE tables on the packed-head layout: cos/sin [B*S, D] f32.

    Column h*Dh + j carries cos/sin(pos * inv_freq[j % (Dh/2)]) — the per-head
    [c, c] pattern tiled across heads — so the QKV kernel can apply RoPE on the
    [M, D] projection output without a head split."""
    half = HEAD_DIM // 2
    inv_freq = 1.0 / (ROPE_BASE ** (jnp.arange(half, dtype=F32) / half))
    ang = input_pos.astype(F32).reshape(-1)[:, None] * inv_freq      # [M, half]
    cos = jnp.tile(jnp.cos(ang), (1, 2 * N_HEADS))                    # [M, D]
    sin = jnp.tile(jnp.sin(ang), (1, 2 * N_HEADS))
    return cos, sin


def rotate_half_matrix():
    """Constant [D, D] matrix R with (x @ R) == per-head rotate_half(x)."""
    half = HEAD_DIM // 2
    i = jnp.arange(D_MODEL)[:, None]
    j = jnp.arange(D_MODEL)[None, :]
    upper = ((j % HEAD_DIM) < half) & (i == j + half)    # rot[:, j] = -x[:, j+half]
    lower = ((j % HEAD_DIM) >= half) & (i == j - half)   # rot[:, j] = +x[:, j-half]
    return jnp.where(upper, -1.0, jnp.where(lower, 1.0, 0.0)).astype(F32)


def init_params(key):
    keys = iter(jax.random.split(key, 128))

    def nrm(shape, std=0.02):
        return std * jax.random.normal(next(keys), shape, dtype=F32)

    params = {
        'tok_emb': nrm((VOCAB, D_MODEL)),
        'final_norm': jnp.ones((1, D_MODEL), F32),
        'output': nrm((VOCAB, D_MODEL)).astype(BF16),
        'layers': [],
    }
    r = LORA_RANK
    for _ in range(N_LAYERS):
        wq = nrm((D_MODEL, D_MODEL))
        wk = nrm((D_MODEL, D_MODEL))
        wv = nrm((D_MODEL, D_MODEL))
        # LoRA adapters on q_proj / v_proj (torchtune default).  torchtune
        # inits B to zero; init nonzero here so the LoRA path is numerically
        # exercised (intentional deviation from freshly-initialized parity).
        qa, qb = nrm((r, D_MODEL)), nrm((D_MODEL, r))
        va, vb = nrm((r, D_MODEL)), nrm((D_MODEL, r))
        # Stack the LoRA up-projections into one block matrix so the kernel
        # runs a single [M,2r]x[2r,2D] matmul and slices at 128-aligned lanes.
        bcat = jnp.zeros((2 * r, 2 * D_MODEL), F32)
        bcat = bcat.at[:r, :D_MODEL].set(qb.T).at[r:, D_MODEL:].set(vb.T)
        params['layers'].append({
            'attn_norm': jnp.ones((1, D_MODEL), F32),
            'mlp_norm': jnp.ones((1, D_MODEL), F32),
            # q/k/v stacked into one [3D, D] weight -> single N=384 matmul.
            'wqkv': jnp.concatenate([wq, wk, wv], axis=0).astype(BF16),
            'wo': nrm((D_MODEL, D_MODEL)).astype(BF16),        # PyTorch [D_out, D_in]
            'lora_a': jnp.concatenate([qa, va], axis=0).astype(BF16),   # [2r, D]
            'lora_b': bcat.astype(BF16),                                # [2r, 2D]
            # gate/up projections stacked -> single N=2*D_MLP matmul.
            'w13': jnp.concatenate([nrm((D_MLP, D_MODEL)),
                                    nrm((D_MLP, D_MODEL))], axis=0).astype(BF16),
            'w2': nrm((D_MODEL, D_MLP)).astype(BF16),
        })
    return params


def lora_model_forward(params, tokens, mask, input_pos):
    """Equivalent of LoRAModel.forward: logits = model(tokens, mask, input_pos)."""
    b, s = tokens.shape
    d = D_MODEL
    m = b * s
    x = params['tok_emb'][tokens].reshape(m, d)       # [B*S, D] f32 (gather = XLA glue)
    cos2d, sin2d = rope_tables_2d(input_pos)          # layer-independent, computed once
    rot = rotate_half_matrix()                        # constant, folded by jit
    # TODO(synk): `mask` is assumed to be the standard causal mask; the attention
    # kernel regenerates it in-register.  Arbitrary user masks (packed sequences /
    # KV-cache decode with position offsets) would need a mask/positions input path.
    del mask

    for layer in params['layers']:
        # ---- self-attention block ----
        # norm + stacked QKV + LoRA + RoPE fused; q/k/v come back as bf16 [M, D];
        # the [M, D] -> [B, S, D] reshape below is metadata only (no transpose/cast).
        q, k, v = fused_qkv(x, layer['attn_norm'], layer['wqkv'],
                            layer['lora_a'], layer['lora_b'], cos2d, sin2d, rot)
        x = attention_block(q.reshape(b, s, d), k.reshape(b, s, d),
                            v.reshape(b, s, d), layer['wo'], x)

        # ---- MLP block: norm + SwiGLU + residual fused in one kernel ----
        x = mlp_block(x, layer['mlp_norm'], layer['w13'], layer['w2'])

    logits = lm_head(x, params['final_norm'], params['output'])
    return logits.reshape(b, s, VOCAB)

# TODO(synk): checkpoint load/save, activation checkpointing and adapter
# state-dict merging are training/IO machinery with no kernel equivalent.


if __name__ == "__main__":
    key = jax.random.PRNGKey(0)
    pkey, tkey = jax.random.split(key)
    params = init_params(pkey)

    B, S = 2, 8
    tokens = jax.random.randint(tkey, (B, S), 0, VOCAB, dtype=jnp.int32)
    mask = jnp.tril(jnp.ones((S, S), dtype=bool))[None]      # [1, S, S], True = attend
    input_pos = jnp.broadcast_to(jnp.arange(S, dtype=jnp.int32), (B, S))

    logits = jax.jit(lora_model_forward)(params, tokens, mask, input_pos)
    jax.block_until_ready(logits)
    assert logits.shape == (B, S, VOCAB) and logits.dtype == jnp.float32
    assert bool(jnp.isfinite(logits).all())
    print("KERNEL_OK")
</pallas_src>

<mosaic_0001>
module attributes {stable_mosaic.version = 11 : i64} {
  func.func @_fused_qkv_kernel(%arg0: memref<16x128xf32, #tpu.memory_space<vmem>>, %arg1: memref<1x128xf32, #tpu.memory_space<vmem>>, %arg2: memref<384x128xbf16, #tpu.memory_space<vmem>>, %arg3: memref<16x128xbf16, #tpu.memory_space<vmem>>, %arg4: memref<16x256xbf16, #tpu.memory_space<vmem>>, %arg5: memref<16x128xf32, #tpu.memory_space<vmem>>, %arg6: memref<16x128xf32, #tpu.memory_space<vmem>>, %arg7: memref<128x128xf32, #tpu.memory_space<vmem>>, %arg8: memref<16x128xbf16, #tpu.memory_space<vmem>>, %arg9: memref<16x128xbf16, #tpu.memory_space<vmem>>, %arg10: memref<16x128xbf16, #tpu.memory_space<vmem>>) attributes {dimension_semantics = [], scalar_prefetch = 0 : i64, scratch_operands = 0 : i64, tpu.core_type = #tpu.core_type<tc>} {
    %c0 = arith.constant 0 : index
    %c0_0 = arith.constant 0 : index
    %0 = vector.load %arg0[%c0, %c0_0] : memref<16x128xf32, #tpu.memory_space<vmem>>, vector<16x128xf32>
    %c0_1 = arith.constant 0 : index
    %c0_2 = arith.constant 0 : index
    %1 = vector.load %arg1[%c0_1, %c0_2] : memref<1x128xf32, #tpu.memory_space<vmem>>, vector<1x128xf32>
    %2 = arith.mulf %0, %0 : vector<16x128xf32>
    %cst = arith.constant dense<0.000000e+00> : vector<16xf32>
    %3 = vector.multi_reduction <add>, %2, %cst [1] : vector<16x128xf32> to vector<16xf32>
    %4 = vector.shape_cast %3 : vector<16xf32> to vector<16x1xf32>
    %cst_3 = arith.constant 1.280000e+02 : f32
    %5 = vector.broadcast %cst_3 : f32 to vector<16x1xf32>
    %6 = arith.divf %4, %5 : vector<16x1xf32>
    %cst_4 = arith.constant 9.99999997E-7 : f32
    %7 = vector.broadcast %cst_4 : f32 to vector<16x1xf32>
    %8 = arith.addf %6, %7 : vector<16x1xf32>
    %9 = math.rsqrt %8 : vector<16x1xf32>
    %10 = vector.broadcast %9 : vector<16x1xf32> to vector<16x128xf32>
    %11 = arith.mulf %0, %10 : vector<16x128xf32>
    %12 = vector.broadcast %1 : vector<1x128xf32> to vector<16x128xf32>
    %13 = arith.mulf %11, %12 : vector<16x128xf32>
    %14 = arith.truncf %13 : vector<16x128xf32> to vector<16x128xbf16>
    %c0_5 = arith.constant 0 : index
    %c0_6 = arith.constant 0 : index
    %15 = vector.load %arg2[%c0_5, %c0_6] : memref<384x128xbf16, #tpu.memory_space<vmem>>, vector<384x128xbf16>
    %cst_7 = arith.constant dense<0.000000e+00> : vector<16x384xf32>
    %16 = tpu.matmul %14, %15, %cst_7 {dimension_numbers = #tpu.dot_dimension_numbers<[1], [1], [0], [0], [0, 0, 1, 0], [], []>} : vector<16x128xbf16>, vector<384x128xbf16>, vector<16x384xf32> -> vector<16x384xf32>
    %c0_8 = arith.constant 0 : index
    %c0_9 = arith.constant 0 : index
    %17 = vector.load %arg3[%c0_8, %c0_9] : memref<16x128xbf16, #tpu.memory_space<vmem>>, vector<16x128xbf16>
    %cst_10 = arith.constant dense<0.000000e+00> : vector<16x16xf32>
    %18 = tpu.matmul %14, %17, %cst_10 {dimension_numbers = #tpu.dot_dimension_numbers<[1], [1], [0], [0], [0, 0, 1, 0], [], []>} : vector<16x128xbf16>, vector<16x128xbf16>, vector<16x16xf32> -> vector<16x16xf32>
    %19 = arith.truncf %18 : vector<16x16xf32> to vector<16x16xbf16>
    %c0_11 = arith.constant 0 : index
    %c0_12 = arith.constant 0 : index
    %20 = vector.load %arg4[%c0_11, %c0_12] : memref<16x256xbf16, #tpu.memory_space<vmem>>, vector<16x256xbf16>
    %cst_13 = arith.constant dense<0.000000e+00> : vector<16x256xf32>
    %21 = tpu.matmul %19, %20, %cst_13 {dimension_numbers = #tpu.dot_dimension_numbers<[1], [0], [0], [1], [0, 0, 1, 1], [], []>} : vector<16x16xbf16>, vector<16x256xbf16>, vector<16x256xf32> -> vector<16x256xf32>
    %22 = vector.extract_strided_slice %16 {offsets = [0, 0], sizes = [16, 128], strides = [1, 1]} : vector<16x384xf32> to vector<16x128xf32>
    %23 = vector.extract_strided_slice %21 {offsets = [0, 0], sizes = [16, 128], strides = [1, 1]} : vector<16x256xf32> to vector<16x128xf32>
    %cst_14 = arith.constant 2.000000e+00 : f32
    %24 = vector.broadcast %cst_14 : f32 to vector<16x128xf32>
    %25 = arith.mulf %24, %23 : vector<16x128xf32>
    %26 = arith.addf %22, %25 : vector<16x128xf32>
    %27 = vector.extract_strided_slice %16 {offsets = [0, 128], sizes = [16, 128], strides = [1, 1]} : vector<16x384xf32> to vector<16x128xf32>
    %28 = vector.extract_strided_slice %16 {offsets = [0, 256], sizes = [16, 128], strides = [1, 1]} : vector<16x384xf32> to vector<16x128xf32>
    %29 = vector.extract_strided_slice %21 {offsets = [0, 128], sizes = [16, 128], strides = [1, 1]} : vector<16x256xf32> to vector<16x128xf32>
    %cst_15 = arith.constant 2.000000e+00 : f32
    %30 = vector.broadcast %cst_15 : f32 to vector<16x128xf32>
    %31 = arith.mulf %30, %29 : vector<16x128xf32>
    %32 = arith.addf %28, %31 : vector<16x128xf32>
    %c0_16 = arith.constant 0 : index
    %c0_17 = arith.constant 0 : index
    %33 = vector.load %arg5[%c0_16, %c0_17] : memref<16x128xf32, #tpu.memory_space<vmem>>, vector<16x128xf32>
    %c0_18 = arith.constant 0 : index
    %c0_19 = arith.constant 0 : index
    %34 = vector.load %arg6[%c0_18, %c0_19] : memref<16x128xf32, #tpu.memory_space<vmem>>, vector<16x128xf32>
    %c0_20 = arith.constant 0 : index
    %c0_21 = arith.constant 0 : index
    %35 = vector.load %arg7[%c0_20, %c0_21] : memref<128x128xf32, #tpu.memory_space<vmem>>, vector<128x128xf32>
    %36 = arith.mulf %26, %33 : vector<16x128xf32>
    %cst_22 = arith.constant dense<0.000000e+00> : vector<16x128xf32>
    %37 = tpu.matmul %26, %35, %cst_22 {dimension_numbers = #tpu.dot_dimension_numbers<[1], [0], [0], [1], [0, 0, 1, 1], [], []>} : vector<16x128xf32>, vector<128x128xf32>, vector<16x128xf32> -> vector<16x128xf32>
    %38 = arith.mulf %37, %34 : vector<16x128xf32>
    %39 = arith.addf %36, %38 : vector<16x128xf32>
    %40 = arith.truncf %39 : vector<16x128xf32> to vector<16x128xbf16>
    %c0_23 = arith.constant 0 : index
    %c0_24 = arith.constant 0 : index
    %41 = vector.load %arg8[%c0_23, %c0_24] : memref<16x128xbf16, #tpu.memory_space<vmem>>, vector<16x128xbf16>
    tpu.vector_store %arg8[%c0_23, %c0_24], %40 {strides = array<i32>} : memref<16x128xbf16, #tpu.memory_space<vmem>>, vector<16x128xbf16>,
    %42 = arith.mulf %27, %33 : vector<16x128xf32>
    %cst_25 = arith.constant dense<0.000000e+00> : vector<16x128xf32>
    %43 = tpu.matmul %27, %35, %cst_25 {dimension_numbers = #tpu.dot_dimension_numbers<[1], [0], [0], [1], [0, 0, 1, 1], [], []>} : vector<16x128xf32>, vector<128x128xf32>, vector<16x128xf32> -> vector<16x128xf32>
    %44 = arith.mulf %43, %34 : vector<16x128xf32>
    %45 = arith.addf %42, %44 : vector<16x128xf32>
    %46 = arith.truncf %45 : vector<16x128xf32> to vector<16x128xbf16>
    %c0_26 = arith.constant 0 : index
    %c0_27 = arith.constant 0 : index
    %47 = vector.load %arg9[%c0_26, %c0_27] : memref<16x128xbf16, #tpu.memory_space<vmem>>, vector<16x128xbf16>
    tpu.vector_store %arg9[%c0_26, %c0_27], %46 {strides = array<i32>} : memref<16x128xbf16, #tpu.memory_space<vmem>>, vector<16x128xbf16>,
    %48 = arith.truncf %32 : vector<16x128xf32> to vector<16x128xbf16>
    %c0_28 = arith.constant 0 : index
    %c0_29 = arith.constant 0 : index
    %49 = vector.load %arg10[%c0_28, %c0_29] : memref<16x128xbf16, #tpu.memory_space<vmem>>, vector<16x128xbf16>
    tpu.vector_store %arg10[%c0_28, %c0_29], %48 {strides = array<i32>} : memref<16x128xbf16, #tpu.memory_space<vmem>>, vector<16x128xbf16>,
    return
  }
}

module attributes {stable_mosaic.version = 11 : i64} {
  func.func @_attn_kernel(%arg0: memref<2x8x128xbf16, #tpu.memory_space<vmem>>, %arg1: memref<2x8x128xbf16, #tpu.memory_space<vmem>>, %arg2: memref<2x8x128xbf16, #tpu.memory_space<vmem>>, %arg3: memref<128x128xbf16, #tpu.memory_space<vmem>>, %arg4: memref<16x128xf32, #tpu.memory_space<vmem>>, %arg5: memref<16x128xf32, #tpu.memory_space<vmem>>, %arg6: memref<16x128xbf16, #tpu.memory_space<vmem>>) attributes {dimension_semantics = [], scalar_prefetch = 0 : i64, scratch_operands = 1 : i64, tpu.core_type = #tpu.core_type<tc>} {
    %0 = tpu.iota {dimensions = array<i32: 1>} : vector<2x8x8xi32>
    %1 = tpu.iota {dimensions = array<i32: 2>} : vector<2x8x8xi32>
    %2 = arith.cmpi sle, %1, %0 : vector<2x8x8xi32>
    %c0 = arith.constant 0 : index
    %c0_0 = arith.constant 0 : index
    %c0_1 = arith.constant 0 : index
    %3 = vector.load %arg0[%c0, %c0_0, %c0_1] : memref<2x8x128xbf16, #tpu.memory_space<vmem>>, vector<2x8x32xbf16>
    %c0_2 = arith.constant 0 : index
    %c0_3 = arith.constant 0 : index
    %c0_4 = arith.constant 0 : index
    %4 = vector.load %arg1[%c0_2, %c0_3, %c0_4] : memref<2x8x128xbf16, #tpu.memory_space<vmem>>, vector<2x8x32xbf16>
    %c0_5 = arith.constant 0 : index
    %c0_6 = arith.constant 0 : index
    %c0_7 = arith.constant 0 : index
    %5 = vector.load %arg2[%c0_5, %c0_6, %c0_7] : memref<2x8x128xbf16, #tpu.memory_space<vmem>>, vector<2x8x32xbf16>
    "tpu.trace_start"() <{level = 10 : i32, message = "bqd,bkd->bqk"}> : () -> ()
    %cst = arith.constant dense<0.000000e+00> : vector<2x8x8xf32>
    %6 = tpu.matmul %3, %4, %cst {dimension_numbers = #tpu.dot_dimension_numbers<[2], [2], [1], [1], [0, 0, 0, 1, 1, 1], [0], [0]>} : vector<2x8x32xbf16>, vector<2x8x32xbf16>, vector<2x8x8xf32> -> vector<2x8x8xf32>
    "tpu.trace_stop"() : () -> ()
    %cst_8 = arith.constant 0.176776692 : f32
    %7 = vector.broadcast %cst_8 : f32 to vector<2x8x8xf32>
    %8 = arith.mulf %6, %7 : vector<2x8x8xf32>
    %cst_9 = arith.constant -1.000000e+30 : f32
    %9 = vector.broadcast %cst_9 : f32 to vector<2x8x8xf32>
    %10 = arith.select %2, %8, %9 : vector<2x8x8xi1>, vector<2x8x8xf32>
    %cst_10 = arith.constant dense<0xFF800000> : vector<2x8xf32>
    %11 = vector.multi_reduction <maximumf>, %10, %cst_10 [2] : vector<2x8x8xf32> to vector<2x8xf32>
    %12 = vector.shape_cast %11 : vector<2x8xf32> to vector<2x8x1xf32>
    %13 = vector.broadcast %12 : vector<2x8x1xf32> to vector<2x8x8xf32>
    %14 = arith.subf %10, %13 : vector<2x8x8xf32>
    %15 = math.exp %14 : vector<2x8x8xf32>
    %cst_11 = arith.constant dense<0.000000e+00> : vector<2x8xf32>
    %16 = vector.multi_reduction <add>, %15, %cst_11 [2] : vector<2x8x8xf32> to vector<2x8xf32>
    %17 = vector.shape_cast %16 : vector<2x8xf32> to vector<2x8x1xf32>
    %18 = tpu.reciprocal %17 {approx = true} : vector<2x8x1xf32> -> vector<2x8x1xf32>
    %19 = vector.broadcast %18 : vector<2x8x1xf32> to vector<2x8x8xf32>
    %20 = arith.mulf %15, %19 : vector<2x8x8xf32>
    %21 = arith.truncf %20 : vector<2x8x8xf32> to vector<2x8x8xbf16>
    "tpu.trace_start"() <{level = 10 : i32, message = "bqk,bkd->bqd"}> : () -> ()
    %cst_12 = arith.constant dense<0.000000e+00> : vector<2x8x32xf32>
    %22 = tpu.matmul %21, %5, %cst_12 {dimension_numbers = #tpu.dot_dimension_numbers<[2], [1], [1], [2], [0, 0, 0, 1, 1, 2], [0], [0]>} : vector<2x8x8xbf16>, vector<2x8x32xbf16>, vector<2x8x32xf32> -> vector<2x8x32xf32>
    "tpu.trace_stop"() : () -> ()
    %23 = vector.shape_cast %22 : vector<2x8x32xf32> to vector<16x32xf32>
    %24 = arith.truncf %23 : vector<16x32xf32> to vector<16x32xbf16>
    %c0_13 = arith.constant 0 : index
    %c0_14 = arith.constant 0 : index
    %25 = vector.load %arg6[%c0_13, %c0_14] : memref<16x128xbf16, #tpu.memory_space<vmem>>, vector<16x32xbf16>
    tpu.vector_store %arg6[%c0_13, %c0_14], %24 {strides = array<i32>} : memref<16x128xbf16, #tpu.memory_space<vmem>>, vector<16x32xbf16>,
    %c0_15 = arith.constant 0 : index
    %c0_16 = arith.constant 0 : index
    %c32 = arith.constant 32 : index
    %26 = vector.load %arg0[%c0_15, %c0_16, %c32] : memref<2x8x128xbf16, #tpu.memory_space<vmem>>, vector<2x8x32xbf16>
    %c0_17 = arith.constant 0 : index
    %c0_18 = arith.constant 0 : index
    %c32_19 = arith.constant 32 : index
    %27 = vector.load %arg1[%c0_17, %c0_18, %c32_19] : memref<2x8x128xbf16, #tpu.memory_space<vmem>>, vector<2x8x32xbf16>
    %c0_20 = arith.constant 0 : index
    %c0_21 = arith.constant 0 : index
    %c32_22 = arith.constant 32 : index
    %28 = vector.load %arg2[%c0_20, %c0_21, %c32_22] : memref<2x8x128xbf16, #tpu.memory_space<vmem>>, vector<2x8x32xbf16>
    "tpu.trace_start"() <{level = 10 : i32, message = "bqd,bkd->bqk"}> : () -> ()
    %cst_23 = arith.constant dense<0.000000e+00> : vector<2x8x8xf32>
    %29 = tpu.matmul %26, %27, %cst_23 {dimension_numbers = #tpu.dot_dimension_numbers<[2], [2], [1], [1], [0, 0, 0, 1, 1, 1], [0], [0]>} : vector<2x8x32xbf16>, vector<2x8x32xbf16>, vector<2x8x8xf32> -> vector<2x8x8xf32>
    "tpu.trace_stop"() : () -> ()
    %cst_24 = arith.constant 0.176776692 : f32
    %30 = vector.broadcast %cst_24 : f32 to vector<2x8x8xf32>
    %31 = arith.mulf %29, %30 : vector<2x8x8xf32>
    %cst_25 = arith.constant -1.000000e+30 : f32
    %32 = vector.broadcast %cst_25 : f32 to vector<2x8x8xf32>
    %33 = arith.select %2, %31, %32 : vector<2x8x8xi1>, vector<2x8x8xf32>
    %cst_26 = arith.constant dense<0xFF800000> : vector<2x8xf32>
    %34 = vector.multi_reduction <maximumf>, %33, %cst_26 [2] : vector<2x8x8xf32> to vector<2x8xf32>
    %35 = vector.shape_cast %34 : vector<2x8xf32> to vector<2x8x1xf32>
    %36 = vector.broadcast %35 : vector<2x8x1xf32> to vector<2x8x8xf32>
    %37 = arith.subf %33, %36 : vector<2x8x8xf32>
    %38 = math.exp %37 : vector<2x8x8xf32>
    %cst_27 = arith.constant dense<0.000000e+00> : vector<2x8xf32>
    %39 = vector.multi_reduction <add>, %38, %cst_27 [2] : vector<2x8x8xf32> to vector<2x8xf32>
    %40 = vector.shape_cast %39 : vector<2x8xf32> to vector<2x8x1xf32>
    %41 = tpu.reciprocal %40 {approx = true} : vector<2x8x1xf32> -> vector<2x8x1xf32>
    %42 = vector.broadcast %41 : vector<2x8x1xf32> to vector<2x8x8xf32>
    %43 = arith.mulf %38, %42 : vector<2x8x8xf32>
    %44 = arith.truncf %43 : vector<2x8x8xf32> to vector<2x8x8xbf16>
    "tpu.trace_start"() <{level = 10 : i32, message = "bqk,bkd->bqd"}> : () -> ()
    %cst_28 = arith.constant dense<0.000000e+00> : vector<2x8x32xf32>
    %45 = tpu.matmul %44, %28, %cst_28 {dimension_numbers = #tpu.dot_dimension_numbers<[2], [1], [1], [2], [0, 0, 0, 1, 1, 2], [0], [0]>} : vector<2x8x8xbf16>, vector<2x8x32xbf16>, vector<2x8x32xf32> -> vector<2x8x32xf32>
    "tpu.trace_stop"() : () -> ()
    %46 = vector.shape_cast %45 : vector<2x8x32xf32> to vector<16x32xf32>
    %47 = arith.truncf %46 : vector<16x32xf32> to vector<16x32xbf16>
    %c0_29 = arith.constant 0 : index
    %c32_30 = arith.constant 32 : index
    %48 = vector.load %arg6[%c0_29, %c32_30] : memref<16x128xbf16, #tpu.memory_space<vmem>>, vector<16x32xbf16>
    tpu.vector_store %arg6[%c0_29, %c32_30], %47 {strides = array<i32>} : memref<16x128xbf16, #tpu.memory_space<vmem>>, vector<16x32xbf16>,
    %c0_31 = arith.constant 0 : index
    %c0_32 = arith.constant 0 : index
    %c64 = arith.constant 64 : index
    %49 = vector.load %arg0[%c0_31, %c0_32, %c64] : memref<2x8x128xbf16, #tpu.memory_space<vmem>>, vector<2x8x32xbf16>
    %c0_33 = arith.constant 0 : index
    %c0_34 = arith.constant 0 : index
    %c64_35 = arith.constant 64 : index
    %50 = vector.load %arg1[%c0_33, %c0_34, %c64_35] : memref<2x8x128xbf16, #tpu.memory_space<vmem>>, vector<2x8x32xbf16>
    %c0_36 = arith.constant 0 : index
    %c0_37 = arith.constant 0 : index
    %c64_38 = arith.constant 64 : index
    %51 = vector.load %arg2[%c0_36, %c0_37, %c64_38] : memref<2x8x128xbf16, #tpu.memory_space<vmem>>, vector<2x8x32xbf16>
    "tpu.trace_start"() <{level = 10 : i32, message = "bqd,bkd->bqk"}> : () -> ()
    %cst_39 = arith.constant dense<0.000000e+00> : vector<2x8x8xf32>
    %52 = tpu.matmul %49, %50, %cst_39 {dimension_numbers = #tpu.dot_dimension_numbers<[2], [2], [1], [1], [0, 0, 0, 1, 1, 1], [0], [0]>} : vector<2x8x32xbf16>, vector<2x8x32xbf16>, vector<2x8x8xf32> -> vector<2x8x8xf32>
    "tpu.trace_stop"() : () -> ()
    %cst_40 = arith.constant 0.176776692 : f32
    %53 = vector.broadcast %cst_40 : f32 to vector<2x8x8xf32>
    %54 = arith.mulf %52, %53 : vector<2x8x8xf32>
    %cst_41 = arith.constant -1.000000e+30 : f32
    %55 = vector.broadcast %cst_41 : f32 to vector<2x8x8xf32>
    %56 = arith.select %2, %54, %55 : vector<2x8x8xi1>, vector<2x8x8xf32>
    %cst_42 = arith.constant dense<0xFF800000> : vector<2x8xf32>
    %57 = vector.multi_reduction <maximumf>, %56, %cst_42 [2] : vector<2x8x8xf32> to vector<2x8xf32>
    %58 = vector.shape_cast %57 : vector<2x8xf32> to vector<2x8x1xf32>
    %59 = vector.broadcast %58 : vector<2x8x1xf32> to vector<2x8x8xf32>
    %60 = arith.subf %56, %59 : vector<2x8x8xf32>
    %61 = math.exp %60 : vector<2x8x8xf32>
    %cst_43 = arith.constant dense<0.000000e+00> : vector<2x8xf32>
    %62 = vector.multi_reduction <add>, %61, %cst_43 [2] : vector<2x8x8xf32> to vector<2x8xf32>
    %63 = vector.shape_cast %62 : vector<2x8xf32> to vector<2x8x1xf32>
    %64 = tpu.reciprocal %63 {approx = true} : vector<2x8x1xf32> -> vector<2x8x1xf32>
    %65 = vector.broadcast %64 : vector<2x8x1xf32> to vector<2x8x8xf32>
    %66 = arith.mulf %61, %65 : vector<2x8x8xf32>
    %67 = arith.truncf %66 : vector<2x8x8xf32> to vector<2x8x8xbf16>
    "tpu.trace_start"() <{level = 10 : i32, message = "bqk,bkd->bqd"}> : () -> ()
    %cst_44 = arith.constant dense<0.000000e+00> : vector<2x8x32xf32>
    %68 = tpu.matmul %67, %51, %cst_44 {dimension_numbers = #tpu.dot_dimension_numbers<[2], [1], [1], [2], [0, 0, 0, 1, 1, 2], [0], [0]>} : vector<2x8x8xbf16>, vector<2x8x32xbf16>, vector<2x8x32xf32> -> vector<2x8x32xf32>
    "tpu.trace_stop"() : () -> ()
    %69 = vector.shape_cast %68 : vector<2x8x32xf32> to vector<16x32xf32>
    %70 = arith.truncf %69 : vector<16x32xf32> to vector<16x32xbf16>
    %c0_45 = arith.constant 0 : index
    %c64_46 = arith.constant 64 : index
    %71 = vector.load %arg6[%c0_45, %c64_46] : memref<16x128xbf16, #tpu.memory_space<vmem>>, vector<16x32xbf16>
    tpu.vector_store %arg6[%c0_45, %c64_46], %70 {strides = array<i32>} : memref<16x128xbf16, #tpu.memory_space<vmem>>, vector<16x32xbf16>,
    %c0_47 = arith.constant 0 : index
    %c0_48 = arith.constant 0 : index
    %c96 = arith.constant 96 : index
    %72 = vector.load %arg0[%c0_47, %c0_48, %c96] : memref<2x8x128xbf16, #tpu.memory_space<vmem>>, vector<2x8x32xbf16>
    %c0_49 = arith.constant 0 : index
    %c0_50 = arith.constant 0 : index
    %c96_51 = arith.constant 96 : index
    %73 = vector.load %arg1[%c0_49, %c0_50, %c96_51] : memref<2x8x128xbf16, #tpu.memory_space<vmem>>, vector<2x8x32xbf16>
    %c0_52 = arith.constant 0 : index
    %c0_53 = arith.constant 0 : index
    %c96_54 = arith.constant 96 : index
    %74 = vector.load %arg2[%c0_52, %c0_53, %c96_54] : memref<2x8x128xbf16, #tpu.memory_space<vmem>>, vector<2x8x32xbf16>
    "tpu.trace_start"() <{level = 10 : i32, message = "bqd,bkd->bqk"}> : () -> ()
    %cst_55 = arith.constant dense<0.000000e+00> : vector<2x8x8xf32>
    %75 = tpu.matmul %72, %73, %cst_55 {dimension_numbers = #tpu.dot_dimension_numbers<[2], [2], [1], [1], [0, 0, 0, 1, 1, 1], [0], [0]>} : vector<2x8x32xbf16>, vector<2x8x32xbf16>, vector<2x8x8xf32> -> vector<2x8x8xf32>
    "tpu.trace_stop"() : () -> ()
    %cst_56 = arith.constant 0.176776692 : f32
    %76 = vector.broadcast %cst_56 : f32 to vector<2x8x8xf32>
    %77 = arith.mulf %75, %76 : vector<2x8x8xf32>
    %cst_57 = arith.constant -1.000000e+30 : f32
    %78 = vector.broadcast %cst_57 : f32 to vector<2x8x8xf32>
    %79 = arith.select %2, %77, %78 : vector<2x8x8xi1>, vector<2x8x8xf32>
    %cst_58 = arith.constant dense<0xFF800000> : vector<2x8xf32>
    %80 = vector.multi_reduction <maximumf>, %79, %cst_58 [2] : vector<2x8x8xf32> to vector<2x8xf32>
    %81 = vector.shape_cast %80 : vector<2x8xf32> to vector<2x8x1xf32>
    %82 = vector.broadcast %81 : vector<2x8x1xf32> to vector<2x8x8xf32>
    %83 = arith.subf %79, %82 : vector<2x8x8xf32>
    %84 = math.exp %83 : vector<2x8x8xf32>
    %cst_59 = arith.constant dense<0.000000e+00> : vector<2x8xf32>
    %85 = vector.multi_reduction <add>, %84, %cst_59 [2] : vector<2x8x8xf32> to vector<2x8xf32>
    %86 = vector.shape_cast %85 : vector<2x8xf32> to vector<2x8x1xf32>
    %87 = tpu.reciprocal %86 {approx = true} : vector<2x8x1xf32> -> vector<2x8x1xf32>
    %88 = vector.broadcast %87 : vector<2x8x1xf32> to vector<2x8x8xf32>
    %89 = arith.mulf %84, %88 : vector<2x8x8xf32>
    %90 = arith.truncf %89 : vector<2x8x8xf32> to vector<2x8x8xbf16>
    "tpu.trace_start"() <{level = 10 : i32, message = "bqk,bkd->bqd"}> : () -> ()
    %cst_60 = arith.constant dense<0.000000e+00> : vector<2x8x32xf32>
    %91 = tpu.matmul %90, %74, %cst_60 {dimension_numbers = #tpu.dot_dimension_numbers<[2], [1], [1], [2], [0, 0, 0, 1, 1, 2], [0], [0]>} : vector<2x8x8xbf16>, vector<2x8x32xbf16>, vector<2x8x32xf32> -> vector<2x8x32xf32>
    "tpu.trace_stop"() : () -> ()
    %92 = vector.shape_cast %91 : vector<2x8x32xf32> to vector<16x32xf32>
    %93 = arith.truncf %92 : vector<16x32xf32> to vector<16x32xbf16>
    %c0_61 = arith.constant 0 : index
    %c96_62 = arith.constant 96 : index
    %94 = vector.load %arg6[%c0_61, %c96_62] : memref<16x128xbf16, #tpu.memory_space<vmem>>, vector<16x32xbf16>
    tpu.vector_store %arg6[%c0_61, %c96_62], %93 {strides = array<i32>} : memref<16x128xbf16, #tpu.memory_space<vmem>>, vector<16x32xbf16>,
    %c0_63 = arith.constant 0 : index
    %c0_64 = arith.constant 0 : index
    %95 = vector.load %arg4[%c0_63, %c0_64] : memref<16x128xf32, #tpu.memory_space<vmem>>, vector<16x128xf32>
    %c0_65 = arith.constant 0 : index
    %c0_66 = arith.constant 0 : index
    %96 = vector.load %arg6[%c0_65, %c0_66] : memref<16x128xbf16, #tpu.memory_space<vmem>>, vector<16x128xbf16>
    %c0_67 = arith.constant 0 : index
    %c0_68 = arith.constant 0 : index
    %97 = vector.load %arg3[%c0_67, %c0_68] : memref<128x128xbf16, #tpu.memory_space<vmem>>, vector<128x128xbf16>
    %cst_69 = arith.constant dense<0.000000e+00> : vector<16x128xf32>
    %98 = tpu.matmul %96, %97, %cst_69 {dimension_numbers = #tpu.dot_dimension_numbers<[1], [1], [0], [0], [0, 0, 1, 0], [], []>} : vector<16x128xbf16>, vector<128x128xbf16>, vector<16x128xf32> -> vector<16x128xf32>
    %99 = arith.addf %95, %98 : vector<16x128xf32>
    %c0_70 = arith.constant 0 : index
    %c0_71 = arith.constant 0 : index
    %100 = vector.load %arg5[%c0_70, %c0_71] : memref<16x128xf32, #tpu.memory_space<vmem>>, vector<16x128xf32>
    tpu.vector_store %arg5[%c0_70, %c0_71], %99 {strides = array<i32>} : memref<16x128xf32, #tpu.memory_space<vmem>>, vector<16x128xf32>,
    return
  }
}

module attributes {stable_mosaic.version = 11 : i64} {
  func.func @_mlp_kernel(%arg0: memref<16x128xf32, #tpu.memory_space<vmem>>, %arg1: memref<1x128xf32, #tpu.memory_space<vmem>>, %arg2: memref<512x128xbf16, #tpu.memory_space<vmem>>, %arg3: memref<128x256xbf16, #tpu.memory_space<vmem>>, %arg4: memref<16x128xf32, #tpu.memory_space<vmem>>) attributes {dimension_semantics = [], scalar_prefetch = 0 : i64, scratch_operands = 0 : i64, tpu.core_type = #tpu.core_type<tc>} {
    %c0 = arith.constant 0 : index
    %c0_0 = arith.constant 0 : index
    %0 = vector.load %arg0[%c0, %c0_0] : memref<16x128xf32, #tpu.memory_space<vmem>>, vector<16x128xf32>
    %c0_1 = arith.constant 0 : index
    %c0_2 = arith.constant 0 : index
    %1 = vector.load %arg1[%c0_1, %c0_2] : memref<1x128xf32, #tpu.memory_space<vmem>>, vector<1x128xf32>
    %2 = arith.mulf %0, %0 : vector<16x128xf32>
    %cst = arith.constant dense<0.000000e+00> : vector<16xf32>
    %3 = vector.multi_reduction <add>, %2, %cst [1] : vector<16x128xf32> to vector<16xf32>
    %4 = vector.shape_cast %3 : vector<16xf32> to vector<16x1xf32>
    %cst_3 = arith.constant 1.280000e+02 : f32
    %5 = vector.broadcast %cst_3 : f32 to vector<16x1xf32>
    %6 = arith.divf %4, %5 : vector<16x1xf32>
    %cst_4 = arith.constant 9.99999997E-7 : f32
    %7 = vector.broadcast %cst_4 : f32 to vector<16x1xf32>
    %8 = arith.addf %6, %7 : vector<16x1xf32>
    %9 = math.rsqrt %8 : vector<16x1xf32>
    %10 = vector.broadcast %9 : vector<16x1xf32> to vector<16x128xf32>
    %11 = arith.mulf %0, %10 : vector<16x128xf32>
    %12 = vector.broadcast %1 : vector<1x128xf32> to vector<16x128xf32>
    %13 = arith.mulf %11, %12 : vector<16x128xf32>
    %14 = arith.truncf %13 : vector<16x128xf32> to vector<16x128xbf16>
    %c0_5 = arith.constant 0 : index
    %c0_6 = arith.constant 0 : index
    %15 = vector.load %arg2[%c0_5, %c0_6] : memref<512x128xbf16, #tpu.memory_space<vmem>>, vector<512x128xbf16>
    %cst_7 = arith.constant dense<0.000000e+00> : vector<16x512xf32>
    %16 = tpu.matmul %14, %15, %cst_7 {dimension_numbers = #tpu.dot_dimension_numbers<[1], [1], [0], [0], [0, 0, 1, 0], [], []>} : vector<16x128xbf16>, vector<512x128xbf16>, vector<16x512xf32> -> vector<16x512xf32>
    %17 = vector.extract_strided_slice %16 {offsets = [0, 0], sizes = [16, 256], strides = [1, 1]} : vector<16x512xf32> to vector<16x256xf32>
    %18 = arith.negf %17 : vector<16x256xf32>
    %19 = math.exp %18 : vector<16x256xf32>
    %cst_8 = arith.constant 1.000000e+00 : f32
    %20 = vector.broadcast %cst_8 : f32 to vector<16x256xf32>
    %21 = arith.addf %20, %19 : vector<16x256xf32>
    %22 = arith.divf %20, %21 : vector<16x256xf32>
    %23 = arith.mulf %17, %22 : vector<16x256xf32>
    %24 = vector.extract_strided_slice %16 {offsets = [0, 256], sizes = [16, 256], strides = [1, 1]} : vector<16x512xf32> to vector<16x256xf32>
    %25 = arith.mulf %23, %24 : vector<16x256xf32>
    %26 = arith.truncf %25 : vector<16x256xf32> to vector<16x256xbf16>
    %c0_9 = arith.constant 0 : index
    %c0_10 = arith.constant 0 : index
    %27 = vector.load %arg3[%c0_9, %c0_10] : memref<128x256xbf16, #tpu.memory_space<vmem>>, vector<128x256xbf16>
    %cst_11 = arith.constant dense<0.000000e+00> : vector<16x128xf32>
    %28 = tpu.matmul %26, %27, %cst_11 {dimension_numbers = #tpu.dot_dimension_numbers<[1], [1], [0], [0], [0, 0, 1, 0], [], []>} : vector<16x256xbf16>, vector<128x256xbf16>, vector<16x128xf32> -> vector<16x128xf32>
    %29 = arith.addf %0, %28 : vector<16x128xf32>
    %c0_12 = arith.constant 0 : index
    %c0_13 = arith.constant 0 : index
    %30 = vector.load %arg4[%c0_12, %c0_13] : memref<16x128xf32, #tpu.memory_space<vmem>>, vector<16x128xf32>
    tpu.vector_store %arg4[%c0_12, %c0_13], %29 {strides = array<i32>} : memref<16x128xf32, #tpu.memory_space<vmem>>, vector<16x128xf32>,
    return
  }
}

module attributes {stable_mosaic.version = 11 : i64} {
  func.func @_head_kernel(%arg0: i32, %arg1: memref<16x128xf32, #tpu.memory_space<vmem>>, %arg2: memref<1x128xf32, #tpu.memory_space<vmem>>, %arg3: memref<128x128xbf16, #tpu.memory_space<vmem>>, %arg4: memref<16x128xf32, #tpu.memory_space<vmem>>, %arg5: memref<16x128xbf16, #tpu.memory_space<vmem>>) attributes {dimension_semantics = [#tpu.dimension_semantics<arbitrary>], iteration_bounds = array<i64: 2>, scalar_prefetch = 0 : i64, scratch_operands = 1 : i64, tpu.core_type = #tpu.core_type<tc>, window_params = [{pipeline_mode = #tpu.pipeline_mode<synchronous>, transform_indices = @transform_0, window_bounds = array<i64: 16, 128>}, {pipeline_mode = #tpu.pipeline_mode<synchronous>, transform_indices = @transform_1, window_bounds = array<i64: 1, 128>}, {transform_indices = @transform_2, window_bounds = array<i64: 128, 128>}, {transform_indices = @transform_3, window_bounds = array<i64: 16, 128>}]} {
    %c0_i32 = arith.constant 0 : i32
    %0 = arith.cmpi eq, %arg0, %c0_i32 : i32
    %1 = arith.extui %0 : i1 to i32
    %c0_i32_0 = arith.constant 0 : i32
    %2 = arith.cmpi ne, %1, %c0_i32_0 : i32
    scf.if %2 {
      %c0_6 = arith.constant 0 : index
      %c0_7 = arith.constant 0 : index
      %7 = vector.load %arg1[%c0_6, %c0_7] : memref<16x128xf32, #tpu.memory_space<vmem>>, vector<16x128xf32>
      %c0_8 = arith.constant 0 : index
      %c0_9 = arith.constant 0 : index
      %8 = vector.load %arg2[%c0_8, %c0_9] : memref<1x128xf32, #tpu.memory_space<vmem>>, vector<1x128xf32>
      %9 = arith.mulf %7, %7 : vector<16x128xf32>
      %cst_10 = arith.constant dense<0.000000e+00> : vector<16xf32>
      %10 = vector.multi_reduction <add>, %9, %cst_10 [1] : vector<16x128xf32> to vector<16xf32>
      %11 = vector.shape_cast %10 : vector<16xf32> to vector<16x1xf32>
      %cst_11 = arith.constant 1.280000e+02 : f32
      %12 = vector.broadcast %cst_11 : f32 to vector<16x1xf32>
      %13 = arith.divf %11, %12 : vector<16x1xf32>
      %cst_12 = arith.constant 9.99999997E-7 : f32
      %14 = vector.broadcast %cst_12 : f32 to vector<16x1xf32>
      %15 = arith.addf %13, %14 : vector<16x1xf32>
      %16 = math.rsqrt %15 : vector<16x1xf32>
      %17 = vector.broadcast %16 : vector<16x1xf32> to vector<16x128xf32>
      %18 = arith.mulf %7, %17 : vector<16x128xf32>
      %19 = vector.broadcast %8 : vector<1x128xf32> to vector<16x128xf32>
      %20 = arith.mulf %18, %19 : vector<16x128xf32>
      %21 = arith.truncf %20 : vector<16x128xf32> to vector<16x128xbf16>
      %c0_13 = arith.constant 0 : index
      %c0_14 = arith.constant 0 : index
      %22 = vector.load %arg5[%c0_13, %c0_14] : memref<16x128xbf16, #tpu.memory_space<vmem>>, vector<16x128xbf16>
      tpu.vector_store %arg5[%c0_13, %c0_14], %21 {strides = array<i32>} : memref<16x128xbf16, #tpu.memory_space<vmem>>, vector<16x128xbf16>,
    } else {
    }
    %c0 = arith.constant 0 : index
    %c0_1 = arith.constant 0 : index
    %3 = vector.load %arg5[%c0, %c0_1] : memref<16x128xbf16, #tpu.memory_space<vmem>>, vector<16x128xbf16>
    %c0_2 = arith.constant 0 : index
    %c0_3 = arith.constant 0 : index
    %4 = vector.load %arg3[%c0_2, %c0_3] : memref<128x128xbf16, #tpu.memory_space<vmem>>, vector<128x128xbf16>
    %cst = arith.constant dense<0.000000e+00> : vector<16x128xf32>
    %5 = tpu.matmul %3, %4, %cst {dimension_numbers = #tpu.dot_dimension_numbers<[1], [1], [0], [0], [0, 0, 1, 0], [], []>} : vector<16x128xbf16>, vector<128x128xbf16>, vector<16x128xf32> -> vector<16x128xf32>
    %c0_4 = arith.constant 0 : index
    %c0_5 = arith.constant 0 : index
    %6 = vector.load %arg4[%c0_4, %c0_5] : memref<16x128xf32, #tpu.memory_space<vmem>>, vector<16x128xf32>
    tpu.vector_store %arg4[%c0_4, %c0_5], %5 {strides = array<i32>} : memref<16x128xf32, #tpu.memory_space<vmem>>, vector<16x128xf32>,
    return
  }
  func.func @transform_0(%arg0: i32) -> (i32, i32) {
    %c0_i32 = arith.constant 0 : i32
    %c0_i32_0 = arith.constant 0 : i32
    %c0_i32_1 = arith.constant 0 : i32
    return %c0_i32, %c0_i32_0 : i32, i32
  }
  func.func @transform_1(%arg0: i32) -> (i32, i32) {
    %c0_i32 = arith.constant 0 : i32
    %c0_i32_0 = arith.constant 0 : i32
    %c0_i32_1 = arith.constant 0 : i32
    return %c0_i32, %c0_i32_0 : i32, i32
  }
  func.func @transform_2(%arg0: i32) -> (i32, i32) {
    %c0_i32 = arith.constant 0 : i32
    %c0_i32_0 = arith.constant 0 : i32
    return %arg0, %c0_i32 : i32, i32
  }
  func.func @transform_3(%arg0: i32) -> (i32, i32) {
    %c0_i32 = arith.constant 0 : i32
    %c0_i32_0 = arith.constant 0 : i32
    return %c0_i32, %arg0 : i32, i32
  }
}

</mosaic_0001>

<bundles_post_ra>
// kernel: tile.14
= control target key start
LH: loop header
LB: loop body
LE: loop exit
PB: predicated region body
PF: predicated region fallthrough
CT: control target
= control target key end

     0   :  { %vm4_vm0 = vcmask 1047556   ;;  %s209_s14 = smov 96   ;;  %s210_s19 = smov 112   ;;  %vm6_vm1 = vcmask 130048   ;;  %vm25_vm2 = vcmask 1048448   ;;  %vm46_vm3 = vcmask 917248   ;;  %s388_s0 = inlined_call_operand.vmem [shape: f32[16,8,16], index: 0, kind: input, shape index: {}]   ;;  %s389_s1 = inlined_call_operand.vmem [shape: f32[16,128], index: 1, kind: output, shape index: {}]  }
   0x1   :  { %v172_v0 = vld [vmem:[%s388_s0 + $0x6] ss:$8 sm:$0xf]   ;;  %v167_v3 = vld [vmem:[%s388_s0 + $0x7] ss:$8 sm:$0xf]  }
   0x2   :  { %v173_v1 = vld [vmem:[%s388_s0 + $0x6] ss:$8 sm:$0xf0]   ;;  %v168_v4 = vld [vmem:[%s388_s0 + $0x7] ss:$8 sm:$0xf0]  }
   0x3   :  { %v43_v2 = vsel %vm4_vm0, %v173_v1, %v172_v0  ;;  %v22_v5 = vsel %vm4_vm0, %v168_v4, %v167_v3  ;;  %v174_v6 = vld [vmem:[%s388_s0 + $0x46] ss:$8 sm:$0xf]   ;;  %v169_v9 = vld [vmem:[%s388_s0 + $0x47] ss:$8 sm:$0xf]  }
   0x4   :  { %44 = vrot.lane.b32.xlu1 %v43_v2, %s209_s14  ;;  %v175_v7 = vld [vmem:[%s388_s0 + $0x46] ss:$8 sm:$0xf0]   ;;  %23 = vrot.lane.b32.xlu0 %v22_v5, %s210_s19  ;;  %v170_v10 = vld [vmem:[%s388_s0 + $0x47] ss:$8 sm:$0xf0]  }
   0x5   :  { %v53_v8 = vsel %vm4_vm0, %v175_v7, %v174_v6  ;;  %v32_v11 = vsel %vm4_vm0, %v170_v10, %v169_v9  ;;  %v179_v12 = vld [vmem:[%s388_s0 + $0x45] ss:$8 sm:$0xf]   ;;  %v184_v18 = vld [vmem:[%s388_s0 + $0x44] ss:$8 sm:$0xf]  }
   0x6   :  { %v180_v13 = vld [vmem:[%s388_s0 + $0x45] ss:$8 sm:$0xf0]   ;;  %v185_v19 = vld [vmem:[%s388_s0 + $0x44] ss:$8 sm:$0xf0]  }
   0x7   :  { %v177_v14 = vld [vmem:[%s388_s0 + $0x5] ss:$8 sm:$0xf]   ;;  %v74_v16 = vsel %vm4_vm0, %v180_v13, %v179_v12  ;;  %v182_v20 = vld [vmem:[%s388_s0 + $0x4] ss:$8 sm:$0xf]   ;;  %v95_v22 = vsel %vm4_vm0, %v185_v19, %v184_v18 }
   0x8   :  { %54 = vrot.lane.b32.xlu1 %v53_v8, %s209_s14  ;;  %v178_v15 = vld [vmem:[%s388_s0 + $0x5] ss:$8 sm:$0xf0]   ;;  %33 = vrot.lane.b32.xlu0 %v32_v11, %s210_s19  ;;  %v183_v21 = vld [vmem:[%s388_s0 + $0x4] ss:$8 sm:$0xf0]  }
   0x9   :  { %v64_v17 = vsel %vm4_vm0, %v178_v15, %v177_v14  ;;  %s211_s11 = smov 80   ;;  %v85_v23 = vsel %vm4_vm0, %v183_v21, %v182_v20  ;;  %v189_v24 = vld [vmem:[%s388_s0 + $0x43] ss:$8 sm:$0xf]   ;;  %s212_s20 = smov 64   ;;  %vm67_vm4 = vcmask 786048  }
   0xa   :  { %v190_v25 = vld [vmem:[%s388_s0 + $0x43] ss:$8 sm:$0xf0]   ;;  %v194_v28 = vld [vmem:[%s388_s0 + $0x42] ss:$8 sm:$0xf]  }
   0xb   :  { %v187_v26 = vld [vmem:[%s388_s0 + $0x3] ss:$8 sm:$0xf]   ;;  %v195_v29 = vld [vmem:[%s388_s0 + $0x42] ss:$8 sm:$0xf0]   ;;  %v116_v30 = vsel %vm4_vm0, %v190_v25, %v189_v24 }
   0xc   :  { %75 = vrot.lane.b32.xlu1 %v74_v16, %s211_s11  ;;  %65 = vrot.lane.b32.xlu0 %v64_v17, %s211_s11  ;;  %v188_v27 = vld [vmem:[%s388_s0 + $0x3] ss:$8 sm:$0xf0]   ;;  %v192_v31 = vld [vmem:[%s388_s0 + $0x2] ss:$8 sm:$0xf]   ;;  %v137_v40 = vsel %vm4_vm0, %v195_v29, %v194_v28 }
   0xd   :  { %v2_v32 = vld [vmem:[%s388_s0] ss:$8 sm:$0xf]   ;;  %v106_v33 = vsel %vm4_vm0, %v188_v27, %v187_v26  ;;  %v193_v36 = vld [vmem:[%s388_s0 + $0x2] ss:$8 sm:$0xf0]  }
   0xe   :  { %v3_v34 = vld [vmem:[%s388_s0] ss:$8 sm:$0xf0]   ;;  %s213_s8 = smov 48   ;;  %v127_v41 = vsel %vm4_vm0, %v193_v36, %v192_v31  ;;  %s215_s21 = smov 16   ;;  %vm88_vm5 = vcmask 654848  }
   0xf   :  { %v164_v35 = vld [vmem:[%s388_s0 + $0x40] ss:$8 sm:$0xf]   ;;  %v5_v37 = vsel %vm4_vm0, %v3_v34, %v2_v32  ;;  %v199_v42 = vld [vmem:[%s388_s0 + $0x41] ss:$8 sm:$0xf]  }
  0x10   :  { %96 = vrot.lane.b32.xlu1 %v95_v22, %s212_s20  ;;  %86 = vrot.lane.b32.xlu0 %v85_v23, %s212_s20  ;;  %v165_v38 = vld [vmem:[%s388_s0 + $0x40] ss:$8 sm:$0xf0]   ;;  %7 = vst.msk [vmem:[%s389_s1] sm:$0xff] %vm6_vm1, %v5_v37   ;;  %vm109_vm6 = vcmask 523648   ;;  %vm130_vm7 = vcmask 392448  }
  0x11   :  { %v13_v39 = vsel %vm4_vm0, %v165_v38, %v164_v35  ;;  %v200_v43 = vld [vmem:[%s388_s0 + $0x41] ss:$8 sm:$0xf0]   ;;  %vm151_vm8 = vcmask 261248  }
  0x12   :  { %166 = vst.msk [vmem:[%s389_s1 + $0x8] sm:$0xff] %vm6_vm1, %v13_v39   ;;  %v197_v44 = vld [vmem:[%s388_s0 + $0x1] ss:$8 sm:$0xf]   ;;  %v158_v46 = vsel %vm4_vm0, %v200_v43, %v199_v42 }
  0x13   :  { %v198_v45 = vld [vmem:[%s388_s0 + $0x1] ss:$8 sm:$0xf0]   ;;  %s214_s0 = smov 32  }
  0x14   :  { %117 = vrot.lane.b32.xlu1 %v116_v30, %s213_s8  ;;  %107 = vrot.lane.b32.xlu0 %v106_v33, %s213_s8  ;;  %v148_v47 = vsel %vm4_vm0, %v198_v45, %v197_v44 }
  0x18   :  { %138 = vrot.lane.b32.xlu1 %v137_v40, %s214_s0  ;;  %128 = vrot.lane.b32.xlu0 %v127_v41, %s214_s0 }
  0x1c   :  { %159 = vrot.lane.b32.xlu1 %v158_v46, %s215_s21  ;;  %149 = vrot.lane.b32.xlu0 %v148_v47, %s215_s21 }
  0x76   :  { %v45_v48 = vpop.permute.xlu1 %44   ;;  %v24_v49 = vpop.permute.xlu0 %23  }
  0x77   :  { %26 = vst.msk [vmem:[%s389_s1] sm:$0xff] %vm25_vm2, %v24_v49  }
  0x78   :  { %47 = vst.msk [vmem:[%s389_s1] sm:$0xff] %vm46_vm3, %v45_v48  }
  0x7a   :  { %v55_v50 = vpop.permute.xlu1 %54   ;;  %v34_v51 = vpop.permute.xlu0 %33  }
  0x7b   :  { %171 = vst.msk [vmem:[%s389_s1 + $0x8] sm:$0xff] %vm25_vm2, %v34_v51  }
  0x7c   :  { %176 = vst.msk [vmem:[%s389_s1 + $0x8] sm:$0xff] %vm46_vm3, %v55_v50  }
  0x7e   :  { %v76_v52 = vpop.permute.xlu1 %75   ;;  %v66_v53 = vpop.permute.xlu0 %65  }
  0x7f   :  { %181 = vst.msk [vmem:[%s389_s1 + $0x8] sm:$0xff] %vm67_vm4, %v76_v52   ;;  %68 = vst.msk [vmem:[%s389_s1] sm:$0xff] %vm67_vm4, %v66_v53  }
  0x82   :  { %v97_v54 = vpop.permute.xlu1 %96   ;;  %v87_v55 = vpop.permute.xlu0 %86  }
  0x83   :  { %186 = vst.msk [vmem:[%s389_s1 + $0x8] sm:$0xff] %vm88_vm5, %v97_v54   ;;  %89 = vst.msk [vmem:[%s389_s1] sm:$0xff] %vm88_vm5, %v87_v55  }
  0x86   :  { %v118_v56 = vpop.permute.xlu1 %117   ;;  %v108_v57 = vpop.permute.xlu0 %107  }
  0x87   :  { %191 = vst.msk [vmem:[%s389_s1 + $0x8] sm:$0xff] %vm109_vm6, %v118_v56   ;;  %110 = vst.msk [vmem:[%s389_s1] sm:$0xff] %vm109_vm6, %v108_v57  }
  0x8a   :  { %v139_v58 = vpop.permute.xlu1 %138   ;;  %v129_v59 = vpop.permute.xlu0 %128  }
  0x8b   :  { %196 = vst.msk [vmem:[%s389_s1 + $0x8] sm:$0xff] %vm130_vm7, %v139_v58   ;;  %131 = vst.msk [vmem:[%s389_s1] sm:$0xff] %vm130_vm7, %v129_v59  }
  0x8e   :  { %v160_v60 = vpop.permute.xlu1 %159   ;;  %v150_v61 = vpop.permute.xlu0 %149  }
  0x8f   :  { %201 = vst.msk [vmem:[%s389_s1 + $0x8] sm:$0xff] %vm151_vm8, %v160_v60   ;;  %152 = vst.msk [vmem:[%s389_s1] sm:$0xff] %vm151_vm8, %v150_v61  }

// kernel: lora_model_forward.13
= control target key start
LH: loop header
LB: loop body
LE: loop exit
PB: predicated region body
PF: predicated region fallthrough
CT: control target
= control target key end

     0   :  { %8 = vsyncpa [#allocation4], 0  ;;  %s714_s0 = inlined_call_operand.vmem [shape: f32[16,128], index: 0, kind: input, shape index: {}]   ;;  %s715_s1 = inlined_call_operand.vmem [shape: f32[1,128], index: 1, kind: input, shape index: {}]   ;;  %s716_s2 = inlined_call_operand.vmem [shape: bf16[256,128], index: 2, kind: input, shape index: {}]   ;;  %s717_s3 = inlined_call_operand.hbm [shape: f32[16,256], index: 3, kind: output, shape index: {}]  }
   0x1   :  { %10 = vsyncpa [#allocation4 + $0x1], 0  ;;  %s583_s12 = smov 0   ;;  %s585_s13 = smov 0  }
   0x2   :  { %s587_s14 = smov 0   ;;  %s589_s15 = smov 0  }
   0x3 LB: > { %s604_s16 = sadd.s32 4294967295, %s555_s15   ;;  %s387_s17 = sadd.s32 4294967294, %s555_s15   ;;  %s555_s15 = sphi %s589_s15, %s723_s15   ;;  %s551_s14 = sphi %s587_s14, %s722_s14   ;;  %s547_s13 = sphi %s585_s13, %s721_s13   ;;  %s543_s12 = sphi %s583_s12, %s720_s12  }
   0x4   : > { %s608_s18 = sadd.s32 1, %s555_s15   ;;  %s91_s19 = sadd.s32 1, %s551_s14 }
   0x5   : > { %s88_s20 = ssub.s32 %s555_s15, %s608_s18  ;;  %p101_p0 = scmp.ne.s32.totalorder %s551_s14, %s547_s13 }
   0x6   : > { %p89_p1 = scmp.eq.s32.totalorder %s88_s20, 0  ;;  %p102_p2 = scmp.eq.s32.totalorder %s604_s16, 1 }
   0x7   : > { %p107_p3 = scmp.ne.s32.totalorder %s547_s13, %s543_s12  ;;  %p108_p4 = scmp.eq.s32.totalorder %s387_s17, 1 }
   0x8   : > { %s619_s21 = scalar_select %p89_p1, %s551_s14, %s91_s19  }
   0x9   : > { %p621_p5 = por %p102_p2, %p101_p0  ;;  %p625_p6 = por %p108_p4, %p107_p3 }
   0xa   : > { %p390_p7 = scmp.ge.s32.totalorder %s555_s15, 1  ;;  %p141_p8 = scmp.lt.s32.totalorder %s555_s15, 3 }
   0xc   : > { %p142_p9 = pnand %p390_p7, %p141_p8 }
   0xd   : > { %s162_s24 = sand.u32 (!%p142_p9), 1, %s547_s13   ;;  %s392_s25 = sshll.u32 (!%p142_p9), %s604_s16, 4 }
   0xe   : > { %145 = sbr.rel (%p142_p9) target bundleno = 488 (0x1e8), region = 32  ;;  %s391_s26 = sshll.u32 (!%p142_p9), %s162_s24, 4 }
   0xf   : > { %p166_p10 = scmp.lt.s32.totalorder (!%p142_p9), %s392_s25, 31  ;;  %s640_s4 = scalar_lea.vmem (!%p142_p9), [#allocation3], %s391_s26 }
  0x10   : > { %p394_p11 = scmp.ne.s32.totalorder (!%p142_p9), %s604_s16, 0 }
  0x15   : > { %s725_s25 = smov (!%p166_p10, %s392_s25), 31  ;;  %175 = sbr.rel (%p394_p11) target bundleno = 193 (0xc1), region = 36 }
  0x16   : > { %s393_s27 = sshll.u32 %s725_s25, 2  ;;  %v176_v0 = vld [vmem:[%s714_s0] sm:$0xff] (!%p394_p11)  ;;  %v177_v1 = vld [vmem:[%s714_s0 + $0x8] sm:$0xff] (!%p394_p11) }
  0x17   : > { %s638_s30 = scalar_lea.vmem %s716_s2, %s393_s27  ;;  %v179_v2 = vmul.f32 (!%p394_p11), %v176_v0, %v176_v0  ;;  %v180_v3 = vmul.f32 (!%p394_p11), %v177_v1, %v177_v1  ;;  %v395_v13 = vld [vmem:[%s715_s1] ss:$0 sm:$0xff] (!%p394_p11) }
  0x19   : > { %181 = vadd.xlane.f32.xlu0 (!%p394_p11), %v179_v2 }
  0x1d   : > { %183 = vadd.xlane.f32.xlu0 %v180_v3 }
  0xa6   : > { %v182_v4 = vpop.xlane.xlu0 %181 }
  0xa7   : > { %v186_v5 = vmul.f32 0.0078125, %v182_v4 }
  0xa9   : > { %v188_v6 = vadd.f32 1e-06, %v186_v5 }
  0xaa   : > { %v184_v7 = vpop.xlane.xlu0 %183 }
  0xab   : > { %481 = vrsqrt.f32 %v188_v6  ;;  %v187_v8 = vmul.f32 0.0078125, %v184_v7 }
  0xad   : > { %v189_v9 = vadd.f32 1e-06, %v187_v8 }
  0xaf   : > { %483 = vrsqrt.f32 %v189_v9 }
  0xb5   : > { %v482_v10 = vpop.eup %481 }
  0xb6   : > { %v192_v11 = vmul.f32 %v482_v10, %v176_v0 }
  0xb8   : > { %v200_v15 = vmul.f32 %v395_v13, %v192_v11 }
  0xb9   : > { %v484_v12 = vpop.eup %483 }
  0xba   : > { %v193_v14 = vmul.f32 %v484_v12, %v177_v1 }
  0xbc   : > { %v201_v16 = vmul.f32 %v395_v13, %v193_v14 }
  0xbe   : > { %v202_v17 = vpack.c.bf16 %v201_v16, %v200_v15 }
  0xc0   : > { %203 = vst [vmem:[#allocation2] sm:$0xff] %v202_v17 }
  0xc1 PF: > { %v485_v18 = vld [vmem:[%s638_s30] sm:$0xff]   ;;  %v557_v19 = vmov 0.0   ;;  %vm558_vm0 = vmmov 0   ;;  %v486_v20 = vld [vmem:[%s638_s30 + $0x8] sm:$0xff]   ;;  %v487_v21 = vld [vmem:[%s638_s30 + $0x10] sm:$0xff]   ;;  %s405_s11 = sshll.u32 %s604_s16, 7 }
  0xc2   : > { %417 = vmatprep.subr.bf16.mxu0 %v557_v19  ;;  %433 = vmatprep.mubr.msk.bf16.mxu0 %vm558_vm0, %v557_v19  ;;  %v488_v22 = vld [vmem:[%s638_s30 + $0x18] sm:$0xff]   ;;  %v489_v23 = vld [vmem:[%s638_s30 + $0x20] sm:$0xff]   ;;  %v490_v24 = vld [vmem:[%s638_s30 + $0x28] sm:$0xff]   ;;  %s325_s17 = sshll.u32 %s640_s4, 4  ;;  %s665_s25 = scalar_lea.hbm %s717_s3, %s405_s11  ;;  %s667_s17 = int_to_ptr.vmem [resolvable:$true] %s325_s17 }
  0xc3   : > { %418 = vmatpush3.bf16.xpose.msra.mxu0 %v485_v18  ;;  %v491_v25 = vld [vmem:[%s638_s30 + $0x30] sm:$0xff]   ;;  %v492_v26 = vld [vmem:[%s638_s30 + $0x38] sm:$0xff]   ;;  %s673_s26 = scalar_lea.sflag [#allocation4], %s162_s24  ;;  %s493_s16 = scalar_lea.vmem %s667_s17, 256 }
  0xc4   : > { %419 = vmatprep.subr.bf16.mxu0 %v557_v19  ;;  %p494_p12 = scmp.ne.s32.totalorder %s667_s17, %s493_s16  ;;  %s559_s27 = smov [#allocation3]  }
  0xc5   : > { %s497_s28 = sshll.u32 %s559_s27, 4  ;;  %s498_s28 = int_to_ptr.vmem [resolvable:$false] %s497_s28 }
  0xc6   : > { %p495_p13 = pnand %p494_p12, %p621_p5  ;;  %s499_s29 = scalar_lea.vmem %s498_s28, 512 }
  0xc7   : > { %v204_v27 = vld [vmem:[#allocation2] sm:$0xff]  ;;  %p500_p1 = scmp.lt.s32.totalorder %s667_s17, %s498_s28  ;;  %p501_p2 = scmp.lt.s32.totalorder %s499_s29, %s493_s16 }
  0xc8   : > { %p496_p0 = pneg %p495_p13 }
  0xc9   : > { %p502_p3 = por %p501_p2, %p500_p1 }
  0xcb   : > { %420 = vmatpush3.bf16.xpose.msra.mxu0 %v486_v20  ;;  %p503_p4 = pnand %p502_p3, %p496_p0 }
  0xcc   : > { %421 = vmatprep.subr.bf16.mxu0 %v557_v19 }
  0xd3   : > { %422 = vmatpush3.bf16.xpose.msra.mxu0 %v487_v21 }
  0xd4   : > { %423 = vmatprep.subr.bf16.mxu0 %v557_v19 }
  0xdb   : > { %424 = vmatpush3.bf16.xpose.msra.mxu0 %v488_v22 }
  0xdc   : > { %425 = vmatprep.subr.bf16.mxu0 %v557_v19 }
  0xe3   : > { %426 = vmatpush3.bf16.xpose.msra.mxu0 %v489_v23 }
  0xe4   : > { %427 = vmatprep.subr.bf16.mxu0 %v557_v19 }
  0xeb   : > { %428 = vmatpush3.bf16.xpose.msra.mxu0 %v490_v24 }
  0xec   : > { %429 = vmatprep.subr.bf16.mxu0 %v557_v19 }
  0xf3   : > { %430 = vmatpush3.bf16.xpose.msra.mxu0 %v491_v25 }
  0xf4   : > { %431 = vmatprep.subr.bf16.mxu0 %v557_v19 }
  0xfb   : > { %432 = vmatpush3.bf16.xpose.msra.mxu0 %v492_v26 }
 0x102   : > { %434 = vmatmul.mubr.bf16.vlgmr.msra.gmra.mrb[0].mxu0 %v204_v27 }
 0x1d5   : > { %v303_v28 = vpop.f32.mrb[0].mxu0 }
 0x1d6   : > { %310 = vst [vmem:[%s640_s4] sm:$0xff] %v303_v28  ;;  %v435_v29 = vpop.f32.mrb[1].mxu0 }
 0x1d7   : > { %v306_v30 = vpop.f32.mrb[2].mxu0 }
 0x1d8   : > { %311 = vst [vmem:[%s640_s4 + $0x8] sm:$0xff] %v306_v30  ;;  %v436_v31 = vpop.f32.mrb[3].mxu0 }
 0x1d9   : > { %506 = shalt.err (!%p503_p4)
}
 0x1da   : > { %s507_s24 = scalar_lea.hbm %s665_s25, 256  ;;  %s511_s5 = scalar_lea.hbm %s717_s3, 512 }
 0x1db   : > { %p508_p7 = scmp.ne.s32.totalorder %s665_s25, %s507_s24  ;;  %p512_p10 = scmp.lt.u32.totalorder %s665_s25, %s717_s3 }
 0x1dc   : > { %p513_p11 = scmp.lt.u32.totalorder %s511_s5, %s507_s24  ;;  %p515_p13 = scmp.lt.u32.totalorder %s507_s24, %s665_s25 }
 0x1dd   : > { %p509_p8 = pnand %p508_p7, %p621_p5 }
 0x1de   : > { %p514_p12 = por %p513_p11, %p512_p10 }
 0x1df   : > { %p510_p9 = pneg %p509_p8 }
 0x1e0   : > { %p516_p0 = por %p515_p13, %p514_p12 }
 0x1e2   : > { %p517_p1 = pnand %p516_p0, %p510_p9 }
 0x1e4   : > { %520 = shalt.err (!%p517_p1)
}
 0x1e5   : > { %s560_s8 = smov 128   ;;  %s561_s9 = smov 256  }
 0x1e6   : > { %s562_s10 = smov 8  }
 0x1e7   : > { %437 = dma.vmem_to_hbm [thread:$0]  (%p621_p5), %s667_s17, 256, %s665_s25, %s673_s26, %s560_s8, %s561_s9, %s562_s10  }
 0x1e8 PF: > { %p443_p2 = scmp.ge.s32.totalorder %s555_s15, 2  ;;  %s340_s11 = sand.u32 1, %s543_s12  }
 0x1e9   : > { %s341_s19 = scalar_lea.sflag [#allocation4], %s340_s11 }
 0x1ea   : > { %p440_p3 = pnand %p443_p2, %p625_p6 }
 0x1ec   : > { %538 = dma.done.wait (!%p440_p3), %s341_s19, 256  }
 0x1ed   : > { %540 = vsyncadd (!%p440_p3), %s341_s19, 4294967040  ;;  %p13_p4 = scmp.ge.s32.totalorder %s608_s18, 4   ;;  %s720_s12 = smov %s547_s13 }
 0x1ee   : > { %s721_s13 = smov %s551_s14  ;;  %s722_s14 = smov %s619_s21 }
 0x1ef   : > { %s723_s15 = smov %s608_s18  ;;  %15 = sbr.rel (!%p13_p4) target bundleno = 3 (0x3), region = 71 }
 0x1f6   :  { %346 = vsyncpa [#allocation4], 1 }
 0x1f7   :  { %348 = vsyncpa [#allocation4 + $0x1], 1 }

// kernel: lora_model_forward.9
= control target key start
LH: loop header
LB: loop body
LE: loop exit
PB: predicated region body
PF: predicated region fallthrough
CT: control target
= control target key end

     0   :  { %s927_s0 = inlined_call_operand.vmem [shape: f32[16,128], index: 0, kind: input, shape index: {}]   ;;  %s928_s2 = inlined_call_operand.vmem [shape: bf16[512,128], index: 2, kind: input, shape index: {}]   ;;  %s929_s3 = inlined_call_operand.vmem [shape: bf16[128,256], index: 3, kind: input, shape index: {}]   ;;  %s930_s1 = inlined_call_operand.vmem [shape: f32[1,128], index: 1, kind: input, shape index: {}]   ;;  %s931_s4 = inlined_call_operand.vmem [shape: f32[16,128], index: 4, kind: output, shape index: {}]  }
   0x1   :  { %v759_v0 = vld [vmem:[%s927_s0] sm:$0xff]  ;;  %v764_v1 = vld [vmem:[%s927_s0 + $0x8] sm:$0xff]  ;;  %v663_v12 = vld [vmem:[%s928_s2 + $0x50] sm:$0xff]  }
   0x2   :  { %v21_v2 = vmul.f32 %v759_v0, %v759_v0  ;;  %v655_v3 = vld [vmem:[%s928_s2 + $0x40] sm:$0xff]   ;;  %v22_v5 = vmul.f32 %v764_v1, %v764_v1  ;;  %v659_v8 = vld [vmem:[%s928_s2 + $0x48] sm:$0xff]   ;;  %v664_v13 = vld [vmem:[%s928_s2 + $0xd0] sm:$0xff]  }
   0x3   :  { %v656_v4 = vld [vmem:[%s928_s2 + $0xc0] sm:$0xff]   ;;  %619 = vmatprep.subr.bf16.mxu0 %v655_v3  ;;  %v660_v9 = vld [vmem:[%s928_s2 + $0xc8] sm:$0xff]   ;;  %v665_v14 = vld [vmem:[%s928_s2 + $0x10] sm:$0xff]  }
   0x4   :  { %23 = vadd.xlane.f32.xlu0 %v21_v2  ;;  %v657_v6 = vld [vmem:[%s928_s2] sm:$0xff]   ;;  %637 = vmatprep.subr.bf16.mxu1 %v656_v4  ;;  %v661_v10 = vld [vmem:[%s928_s2 + $0x8] sm:$0xff]   ;;  %v666_v15 = vld [vmem:[%s928_s2 + $0x90] sm:$0xff]  }
   0x5   :  { %v658_v7 = vld [vmem:[%s928_s2 + $0x80] sm:$0xff]   ;;  %620 = vmatpush3.bf16.xpose.msra.mxu0 %v657_v6  ;;  %v662_v11 = vld [vmem:[%s928_s2 + $0x88] sm:$0xff]   ;;  %v667_v16 = vld [vmem:[%s928_s2 + $0x58] sm:$0xff]  }
   0x6   :  { %638 = vmatpush3.bf16.xpose.msra.mxu1 %v658_v7  ;;  %621 = vmatprep.subr.bf16.mxu0 %v659_v8  ;;  %v668_v17 = vld [vmem:[%s928_s2 + $0xd8] sm:$0xff]   ;;  %v671_v20 = vld [vmem:[%s928_s2 + $0x60] sm:$0xff]   ;;  %v675_v24 = vld [vmem:[%s928_s2 + $0x68] sm:$0xff]  }
   0x7   :  { %639 = vmatprep.subr.bf16.mxu1 %v660_v9  ;;  %v669_v18 = vld [vmem:[%s928_s2 + $0x18] sm:$0xff]   ;;  %v672_v21 = vld [vmem:[%s928_s2 + $0xe0] sm:$0xff]   ;;  %v676_v25 = vld [vmem:[%s928_s2 + $0xe8] sm:$0xff]  }
   0x8   :  { %25 = vadd.xlane.f32.xlu0 %v22_v5  ;;  %v670_v19 = vld [vmem:[%s928_s2 + $0x98] sm:$0xff]   ;;  %v673_v22 = vld [vmem:[%s928_s2 + $0x20] sm:$0xff]   ;;  %v677_v26 = vld [vmem:[%s928_s2 + $0x28] sm:$0xff]  }
   0x9   :  { %v674_v23 = vld [vmem:[%s928_s2 + $0xa0] sm:$0xff]   ;;  %v678_v27 = vld [vmem:[%s928_s2 + $0xa8] sm:$0xff]   ;;  %v679_v28 = vld [vmem:[%s928_s2 + $0x70] sm:$0xff]  }
   0xa   :  { %v680_v29 = vld [vmem:[%s928_s2 + $0xf0] sm:$0xff]   ;;  %v683_v32 = vld [vmem:[%s928_s2 + $0x78] sm:$0xff]   ;;  %v689_v36 = vld [vmem:[%s929_s3 + $0x4] ss:$8 sps:$4 sm:$0xff]  }
   0xb   :  { %v681_v30 = vld [vmem:[%s928_s2 + $0x30] sm:$0xff]   ;;  %v684_v33 = vld [vmem:[%s928_s2 + $0xf8] sm:$0xff]   ;;  %v566_v46 = vld [vmem:[%s930_s1] ss:$0 sm:$0xff] }
   0xc   :  { %v682_v31 = vld [vmem:[%s928_s2 + $0xb0] sm:$0xff]   ;;  %v685_v34 = vld [vmem:[%s928_s2 + $0x38] sm:$0xff]   ;;  %v687_v51 = vld [vmem:[%s929_s3] ss:$8 sps:$4 sm:$0xff]  }
   0xd   :  { %622 = vmatpush3.bf16.xpose.msra.mxu0 %v661_v10  ;;  %v686_v35 = vld [vmem:[%s928_s2 + $0xb8] sm:$0xff]   ;;  %v695_v54 = vld [vmem:[%s929_s3 + $0x24] ss:$8 sps:$4 sm:$0xff]   ;;  %v693_v55 = vld [vmem:[%s929_s3 + $0x20] ss:$8 sps:$4 sm:$0xff]  }
   0xe   :  { %640 = vmatpush3.bf16.xpose.msra.mxu1 %v662_v11  ;;  %623 = vmatprep.subr.bf16.mxu0 %v663_v12  ;;  %v692_v52 = vld [vmem:[%s929_s3 + $0x14] ss:$8 sps:$4 sm:$0xff]   ;;  %v690_v53 = vld [vmem:[%s929_s3 + $0x10] ss:$8 sps:$4 sm:$0xff]   ;;  %v701_v58 = vld [vmem:[%s929_s3 + $0x44] ss:$8 sps:$4 sm:$0xff]  }
   0xf   :  { %641 = vmatprep.subr.bf16.mxu1 %v664_v13  ;;  %v698_v56 = vld [vmem:[%s929_s3 + $0x34] ss:$8 sps:$4 sm:$0xff]   ;;  %v696_v57 = vld [vmem:[%s929_s3 + $0x30] ss:$8 sps:$4 sm:$0xff]   ;;  %v699_v59 = vld [vmem:[%s929_s3 + $0x40] ss:$8 sps:$4 sm:$0xff]  }
  0x10   :  { %v704_v60 = vld [vmem:[%s929_s3 + $0x54] ss:$8 sps:$4 sm:$0xff]   ;;  %v702_v61 = vld [vmem:[%s929_s3 + $0x50] ss:$8 sps:$4 sm:$0xff]   ;;  %v707_v62 = vld [vmem:[%s929_s3 + $0x64] ss:$8 sps:$4 sm:$0xff]  }
  0x11   :  { %v705_v63 = vld [vmem:[%s929_s3 + $0x60] ss:$8 sps:$4 sm:$0xff]   ;;  %v710_v2 = vld [vmem:[%s929_s3 + $0x74] ss:$8 sps:$4 sm:$0xff]   ;;  %v708_v3 = vld [vmem:[%s929_s3 + $0x70] ss:$8 sps:$4 sm:$0xff]  }
  0x15   :  { %624 = vmatpush3.bf16.xpose.msra.mxu0 %v665_v14 }
  0x16   :  { %642 = vmatpush3.bf16.xpose.msra.mxu1 %v666_v15  ;;  %625 = vmatprep.subr.bf16.mxu0 %v667_v16 }
  0x17   :  { %643 = vmatprep.subr.bf16.mxu1 %v668_v17 }
  0x1d   :  { %626 = vmatpush3.bf16.xpose.msra.mxu0 %v669_v18 }
  0x1e   :  { %644 = vmatpush3.bf16.xpose.msra.mxu1 %v670_v19  ;;  %627 = vmatprep.subr.bf16.mxu0 %v671_v20 }
  0x1f   :  { %645 = vmatprep.subr.bf16.mxu1 %v672_v21 }
  0x25   :  { %628 = vmatpush3.bf16.xpose.msra.mxu0 %v673_v22 }
  0x26   :  { %646 = vmatpush3.bf16.xpose.msra.mxu1 %v674_v23  ;;  %629 = vmatprep.subr.bf16.mxu0 %v675_v24 }
  0x27   :  { %647 = vmatprep.subr.bf16.mxu1 %v676_v25 }
  0x2d   :  { %630 = vmatpush3.bf16.xpose.msra.mxu0 %v677_v26 }
  0x2e   :  { %648 = vmatpush3.bf16.xpose.msra.mxu1 %v678_v27  ;;  %631 = vmatprep.subr.bf16.mxu0 %v679_v28 }
  0x2f   :  { %649 = vmatprep.subr.bf16.mxu1 %v680_v29 }
  0x35   :  { %632 = vmatpush3.bf16.xpose.msra.mxu0 %v681_v30 }
  0x36   :  { %650 = vmatpush3.bf16.xpose.msra.mxu1 %v682_v31  ;;  %633 = vmatprep.subr.bf16.mxu0 %v683_v32 }
  0x37   :  { %651 = vmatprep.subr.bf16.mxu1 %v684_v33 }
  0x3d   :  { %634 = vmatpush3.bf16.xpose.msra.mxu0 %v685_v34 }
  0x3e   :  { %652 = vmatpush3.bf16.xpose.msra.mxu1 %v686_v35  ;;  %517 = vmatprep.subr.bf16.mxu0 %v689_v36 }
  0x91   :  { %v24_v37 = vpop.xlane.xlu0 %23 }
  0x92   :  { %v28_v38 = vmul.f32 0.0078125, %v24_v37 }
  0x94   :  { %v30_v39 = vadd.f32 1e-06, %v28_v38 }
  0x95   :  { %v26_v40 = vpop.xlane.xlu0 %25 }
  0x96   :  { %711 = vrsqrt.f32 %v30_v39  ;;  %v29_v41 = vmul.f32 0.0078125, %v26_v40 }
  0x98   :  { %v31_v42 = vadd.f32 1e-06, %v29_v41 }
  0x9a   :  { %713 = vrsqrt.f32 %v31_v42 }
  0xa0   :  { %v712_v43 = vpop.eup %711 }
  0xa1   :  { %v34_v44 = vmul.f32 %v712_v43, %v759_v0 }
  0xa3   :  { %v42_v48 = vmul.f32 %v566_v46, %v34_v44 }
  0xa4   :  { %v714_v45 = vpop.eup %713 }
  0xa5   :  { %v35_v47 = vmul.f32 %v714_v45, %v764_v1 }
  0xa7   :  { %v43_v49 = vmul.f32 %v566_v46, %v35_v47 }
  0xa9   :  { %v44_v50 = vpack.c.bf16 %v43_v49, %v42_v48 }
  0xab   :  { %635 = vmatprep.mubr.bf16.mxu0 %v44_v50  ;;  %653 = vmatprep.mubr.bf16.mxu1 %v44_v50 }
  0xac   :  { %636 = vmatmul.mubr.bf16.vlgmr.msra.gmra.mrb[0].mxu0 %v44_v50  ;;  %654 = vmatmul.mubr.bf16.vlgmr.msra.gmra.mrb[0].mxu1 %v44_v50 }
  0xad   :  { %518 = vmatpush1.bf16.xpose.msra.mxu0 %v687_v51 }
  0xae   :  { %519 = vmatprep.subr.bf16.mxu0 %v692_v52 }
  0xb5   :  { %520 = vmatpush1.bf16.xpose.msra.mxu0 %v690_v53 }
  0xb6   :  { %521 = vmatprep.subr.bf16.mxu0 %v695_v54 }
  0xbd   :  { %522 = vmatpush1.bf16.xpose.msra.mxu0 %v693_v55 }
  0xbe   :  { %523 = vmatprep.subr.bf16.mxu0 %v698_v56 }
  0xc5   :  { %524 = vmatpush1.bf16.xpose.msra.mxu0 %v696_v57 }
  0xc6   :  { %525 = vmatprep.subr.bf16.mxu0 %v701_v58 }
  0xcd   :  { %526 = vmatpush1.bf16.xpose.msra.mxu0 %v699_v59 }
  0xce   :  { %527 = vmatprep.subr.bf16.mxu0 %v704_v60 }
  0xd5   :  { %528 = vmatpush1.bf16.xpose.msra.mxu0 %v702_v61 }
  0xd6   :  { %529 = vmatprep.subr.bf16.mxu0 %v707_v62 }
  0xdd   :  { %530 = vmatpush1.bf16.xpose.msra.mxu0 %v705_v63 }
  0xde   :  { %531 = vmatprep.subr.bf16.mxu0 %v710_v2 }
  0xe5   :  { %532 = vmatpush1.bf16.xpose.msra.mxu0 %v708_v3 }
 0x17f   :  { %v335_v4 = vpop.f32.mrb[0].mxu0  ;;  %v378_v5 = vpop.f32.mrb[0].mxu1 }
 0x180   :  { %v599_v6 = vmul.f32 -1.442695, %v335_v4  ;;  %v337_v7 = vpop.f32.mrb[1].mxu0  ;;  %v380_v8 = vpop.f32.mrb[1].mxu1 }
 0x181   :  { %v600_v9 = vmul.f32 -1.442695, %v337_v7  ;;  %v339_v10 = vpop.f32.mrb[2].mxu0  ;;  %v382_v11 = vpop.f32.mrb[2].mxu1 }
 0x182   :  { %715 = vpow2.f32 %v599_v6  ;;  %v601_v12 = vmul.f32 -1.442695, %v339_v10  ;;  %v341_v13 = vpop.f32.mrb[3].mxu0  ;;  %v384_v14 = vpop.f32.mrb[3].mxu1 }
 0x183   :  { %717 = vpow2.f32 %v600_v9  ;;  %v602_v15 = vmul.f32 -1.442695, %v341_v13 }
 0x184   :  { %719 = vpow2.f32 %v601_v12 }
 0x185   :  { %721 = vpow2.f32 %v602_v15 }
 0x18c   :  { %v716_v16 = vpop.eup %715 }
 0x18d   :  { %v718_v17 = vpop.eup %717  ;;  %v399_v18 = vadd.f32 1.0, %v716_v16 }
 0x18e   :  { %v720_v19 = vpop.eup %719  ;;  %v400_v20 = vadd.f32 1.0, %v718_v17 }
 0x18f   :  { %v722_v21 = vpop.eup %721  ;;  %723 = vrcp.f32 %v399_v18  ;;  %v401_v22 = vadd.f32 1.0, %v720_v19 }
 0x190   :  { %725 = vrcp.f32 %v400_v20  ;;  %v402_v23 = vadd.f32 1.0, %v722_v21 }
 0x191   :  { %727 = vrcp.f32 %v401_v22 }
 0x192   :  { %729 = vrcp.f32 %v402_v23 }
 0x199   :  { %v724_v24 = vpop.eup %723 }
 0x19a   :  { %v726_v25 = vpop.eup %725  ;;  %v411_v26 = vmul.f32 %v724_v24, %v335_v4 }
 0x19b   :  { %v728_v27 = vpop.eup %727  ;;  %v412_v28 = vmul.f32 %v726_v25, %v337_v7 }
 0x19c   :  { %v730_v29 = vpop.eup %729  ;;  %v415_v30 = vmul.f32 %v411_v26, %v378_v5  ;;  %v413_v31 = vmul.f32 %v728_v27, %v339_v10 }
 0x19d   :  { %v416_v32 = vmul.f32 %v412_v28, %v380_v8  ;;  %v414_v33 = vmul.f32 %v730_v29, %v341_v13 }
 0x19e   :  { %v417_v34 = vmul.f32 %v413_v31, %v382_v11 }
 0x19f   :  { %v418_v35 = vmul.f32 %v414_v33, %v384_v14 }
 0x1a0   :  { %v419_v36 = vpack.c.bf16 %v417_v34, %v415_v30 }
 0x1a1   :  { %v420_v37 = vpack.c.bf16 %v418_v35, %v416_v32 }
 0x1a3   :  { %549 = vmatprep.mubr.bf16.mxu0 %v420_v37 }
 0x1a4   :  { %550 = vmatmul.mubr.bf16.vlgmr.msra.gmra.mrb[4].mxu0 %v419_v36 }
 0x277   :  { %v551_v38 = vpop.f32.mrb[4].mxu0 }
 0x278   :  { %v558_v39 = vadd.f32 %v551_v38, %v759_v0  ;;  %v553_v40 = vpop.f32.mrb[5].mxu0 }
 0x279   :  { %v554_v41 = vpop.f32.mrb[6].mxu0 }
 0x27a   :  { %560 = vst [vmem:[%s931_s4] sm:$0xff] %v558_v39  ;;  %v559_v42 = vadd.f32 %v554_v41, %v764_v1  ;;  %v556_v43 = vpop.f32.mrb[7].mxu0 }
 0x27c   :  { %561 = vst [vmem:[%s931_s4 + $0x8] sm:$0xff] %v559_v42 }

// kernel: lora_model_forward.7
= control target key start
LH: loop header
LB: loop body
LE: loop exit
PB: predicated region body
PF: predicated region fallthrough
CT: control target
= control target key end

     0   :  { %v993_v2 = vmov 0.0   ;;  %vm994_vm0 = vmmov 0   ;;  %v995_v49 = vmov 0   ;;  %vm398_vm1 = vcmask 130048   ;;  %s1233_s0 = inlined_call_operand.vmem [shape: f32[16,128], index: 0, kind: input, shape index: {}]   ;;  %s1234_s2 = inlined_call_operand.vmem [shape: bf16[384,128], index: 2, kind: input, shape index: {}]   ;;  %s1235_s3 = inlined_call_operand.vmem [shape: bf16[16,128], index: 3, kind: input, shape index: {}]   ;;  %s1236_s1 = inlined_call_operand.vmem [shape: f32[1,128], index: 1, kind: input, shape index: {}]   ;;  %s1237_s4 = inlined_call_operand.vmem [shape: bf16[16,256], index: 4, kind: input, shape index: {}]   ;;  %s1238_s7 = inlined_call_operand.vmem [shape: f32[128,128], index: 7, kind: input, shape index: {}]   ;;  %s1239_s10 = inlined_call_operand.vmem [shape: bf16[16,128], index: 10, kind: output, shape index: {2}]   ;;  %s1240_s6 = inlined_call_operand.vmem [shape: f32[16,128], index: 6, kind: input, shape index: {}]   ;;  %s1241_s5 = inlined_call_operand.vmem [shape: f32[16,128], index: 5, kind: input, shape index: {}]   ;;  %s1242_s9 = inlined_call_operand.vmem [shape: bf16[16,128], index: 9, kind: output, shape index: {1}]   ;;  %s1243_s8 = inlined_call_operand.vmem [shape: bf16[16,128], index: 8, kind: output, shape index: {0}]  }
   0x1   :  { %v1054_v0 = vld [vmem:[%s1233_s0] sm:$0xff]  ;;  %v1059_v1 = vld [vmem:[%s1233_s0 + $0x8] sm:$0xff]  ;;  %798 = vmatprep.subr.bf16.mxu1 %v993_v2  ;;  %v967_v11 = vld [vmem:[%s1234_s2 + $0x50] sm:$0xff]   ;;  %814 = vmatprep.mubr.msk.bf16.mxu1 %vm994_vm0, %v993_v2 }
   0x2   :  { %v36_v3 = vmul.f32 %v1054_v0, %v1054_v0  ;;  %v961_v4 = vld [vmem:[%s1234_s2 + $0x40] sm:$0xff]   ;;  %v37_v6 = vmul.f32 %v1059_v1, %v1059_v1  ;;  %v964_v8 = vld [vmem:[%s1234_s2 + $0x48] sm:$0xff]   ;;  %v968_v12 = vld [vmem:[%s1234_s2 + $0x10] sm:$0xff]  }
   0x3   :  { %v962_v5 = vld [vmem:[%s1234_s2] sm:$0xff]   ;;  %733 = vmatprep.subr.bf16.mxu0 %v961_v4  ;;  %v965_v9 = vld [vmem:[%s1234_s2 + $0x8] sm:$0xff]   ;;  %v969_v13 = vld [vmem:[%s1234_s2 + $0x90] sm:$0xff]  }
   0x4   :  { %38 = vadd.xlane.f32.xlu0 %v36_v3  ;;  %v963_v7 = vld [vmem:[%s1234_s2 + $0x80] sm:$0xff]   ;;  %734 = vmatpush3.bf16.xpose.msra.mxu0 %v962_v5  ;;  %v966_v10 = vld [vmem:[%s1234_s2 + $0x88] sm:$0xff]   ;;  %v970_v14 = vld [vmem:[%s1234_s2 + $0x58] sm:$0xff]  }
   0x5   :  { %799 = vmatpush3.bf16.xpose.msra.mxu1 %v963_v7  ;;  %735 = vmatprep.subr.bf16.mxu0 %v964_v8  ;;  %v971_v15 = vld [vmem:[%s1234_s2 + $0x18] sm:$0xff]   ;;  %v973_v17 = vld [vmem:[%s1234_s2 + $0x60] sm:$0xff]   ;;  %v976_v20 = vld [vmem:[%s1234_s2 + $0x68] sm:$0xff]  }
   0x6   :  { %800 = vmatprep.subr.bf16.mxu1 %v993_v2  ;;  %v972_v16 = vld [vmem:[%s1234_s2 + $0x98] sm:$0xff]   ;;  %v974_v18 = vld [vmem:[%s1234_s2 + $0x20] sm:$0xff]   ;;  %v977_v21 = vld [vmem:[%s1234_s2 + $0x28] sm:$0xff]  }
   0x7   :  { %v975_v19 = vld [vmem:[%s1234_s2 + $0xa0] sm:$0xff]   ;;  %v978_v22 = vld [vmem:[%s1234_s2 + $0xa8] sm:$0xff]   ;;  %v979_v23 = vld [vmem:[%s1234_s2 + $0x70] sm:$0xff]  }
   0x8   :  { %40 = vadd.xlane.f32.xlu0 %v37_v6  ;;  %v980_v24 = vld [vmem:[%s1234_s2 + $0x30] sm:$0xff]   ;;  %v982_v26 = vld [vmem:[%s1234_s2 + $0x78] sm:$0xff]   ;;  %v677_v38 = vld [vmem:[%s1236_s1] ss:$0 sm:$0xff] }
   0x9   :  { %v981_v25 = vld [vmem:[%s1234_s2 + $0xb0] sm:$0xff]   ;;  %v983_v27 = vld [vmem:[%s1234_s2 + $0x38] sm:$0xff]   ;;  %v985_v43 = vld [vmem:[%s1235_s3] sm:$0xff]  }
   0xa   :  { %v984_v28 = vld [vmem:[%s1234_s2 + $0xb8] sm:$0xff]   ;;  %v986_v44 = vld [vmem:[%s1237_s4] ss:$8 sps:$4 sm:$0xff]   ;;  %v988_v45 = vld [vmem:[%s1237_s4 + $0x4] ss:$8 sps:$4 sm:$0xff]  }
   0xb   :  { %v457_v46 = vld [vmem:[%s1238_s7] sm:$0xff]  ;;  %v458_v47 = vld [vmem:[%s1238_s7 + $0x8] sm:$0xff]  ;;  %v459_v50 = vld [vmem:[%s1238_s7 + $0x10] sm:$0xff] }
   0xc   :  { %736 = vmatpush3.bf16.xpose.msra.mxu0 %v965_v9  ;;  %v894_v48 = vpack.c.bf16 %v458_v47, %v457_v46  ;;  %v460_v51 = vld [vmem:[%s1238_s7 + $0x18] sm:$0xff]  ;;  %v461_v53 = vld [vmem:[%s1238_s7 + $0x20] sm:$0xff]  ;;  %v462_v54 = vld [vmem:[%s1238_s7 + $0x28] sm:$0xff] }
   0xd   :  { %801 = vmatpush3.bf16.xpose.msra.mxu1 %v966_v10  ;;  %737 = vmatprep.subr.bf16.mxu0 %v967_v11  ;;  %v898_v52 = vpack.c.bf16 %v460_v51, %v459_v50  ;;  %v902_v55 = vpack.c.bf16 %v462_v54, %v461_v53  ;;  %v463_v56 = vld [vmem:[%s1238_s7 + $0x30] sm:$0xff]  ;;  %v464_v57 = vld [vmem:[%s1238_s7 + $0x38] sm:$0xff]  ;;  %v465_v59 = vld [vmem:[%s1238_s7 + $0x40] sm:$0xff] }
   0xe   :  { %802 = vmatprep.subr.bf16.mxu1 %v993_v2  ;;  %v906_v58 = vpack.c.bf16 %v464_v57, %v463_v56  ;;  %v466_v60 = vld [vmem:[%s1238_s7 + $0x48] sm:$0xff]  ;;  %v467_v62 = vld [vmem:[%s1238_s7 + $0x50] sm:$0xff]  ;;  %v468_v63 = vld [vmem:[%s1238_s7 + $0x58] sm:$0xff] }
   0xf   :  { %v910_v61 = vpack.c.bf16 %v466_v60, %v465_v59  ;;  %v471_v4 = vld [vmem:[%s1238_s7 + $0x70] sm:$0xff]  ;;  %v472_v5 = vld [vmem:[%s1238_s7 + $0x78] sm:$0xff] }
  0x10   :  { %v922_v6 = vpack.c.bf16 %v472_v5, %v471_v4 }
  0x14   :  { %738 = vmatpush3.bf16.xpose.msra.mxu0 %v968_v12 }
  0x15   :  { %803 = vmatpush3.bf16.xpose.msra.mxu1 %v969_v13  ;;  %739 = vmatprep.subr.bf16.mxu0 %v970_v14 }
  0x16   :  { %804 = vmatprep.subr.bf16.mxu1 %v993_v2 }
  0x1c   :  { %740 = vmatpush3.bf16.xpose.msra.mxu0 %v971_v15 }
  0x1d   :  { %805 = vmatpush3.bf16.xpose.msra.mxu1 %v972_v16  ;;  %741 = vmatprep.subr.bf16.mxu0 %v973_v17 }
  0x1e   :  { %806 = vmatprep.subr.bf16.mxu1 %v993_v2 }
  0x24   :  { %742 = vmatpush3.bf16.xpose.msra.mxu0 %v974_v18 }
  0x25   :  { %807 = vmatpush3.bf16.xpose.msra.mxu1 %v975_v19  ;;  %743 = vmatprep.subr.bf16.mxu0 %v976_v20 }
  0x26   :  { %808 = vmatprep.subr.bf16.mxu1 %v993_v2 }
  0x2c   :  { %744 = vmatpush3.bf16.xpose.msra.mxu0 %v977_v21 }
  0x2d   :  { %809 = vmatpush3.bf16.xpose.msra.mxu1 %v978_v22  ;;  %745 = vmatprep.subr.bf16.mxu0 %v979_v23 }
  0x2e   :  { %810 = vmatprep.subr.bf16.mxu1 %v993_v2 }
  0x34   :  { %746 = vmatpush3.bf16.xpose.msra.mxu0 %v980_v24 }
  0x35   :  { %811 = vmatpush3.bf16.xpose.msra.mxu1 %v981_v25  ;;  %747 = vmatprep.subr.bf16.mxu0 %v982_v26 }
  0x36   :  { %812 = vmatprep.subr.bf16.mxu1 %v993_v2 }
  0x3c   :  { %748 = vmatpush3.bf16.xpose.msra.mxu0 %v983_v27 }
  0x3d   :  { %813 = vmatpush3.bf16.xpose.msra.mxu1 %v984_v28  ;;  %818 = vmatprep.subr.bf16.mxu0 %v993_v2 }
  0x3e   :  { %402 = vmatprep.subr.bf16.mxu1 %v988_v45 }
  0x91   :  { %v39_v29 = vpop.xlane.xlu0 %38 }
  0x92   :  { %v43_v30 = vmul.f32 0.0078125, %v39_v29 }
  0x94   :  { %v45_v31 = vadd.f32 1e-06, %v43_v30 }
  0x95   :  { %v41_v32 = vpop.xlane.xlu0 %40 }
  0x96   :  { %989 = vrsqrt.f32 %v45_v31  ;;  %v44_v33 = vmul.f32 0.0078125, %v41_v32 }
  0x98   :  { %v46_v34 = vadd.f32 1e-06, %v44_v33  ;;  %v454_v33 = vld [vmem:[%s1241_s5 + $0x8] sm:$0xff] }
  0x9a   :  { %991 = vrsqrt.f32 %v46_v34  ;;  %v456_v34 = vld [vmem:[%s1240_s6 + $0x8] sm:$0xff] }
  0xa0   :  { %v990_v35 = vpop.eup %989 }
  0xa1   :  { %v49_v36 = vmul.f32 %v990_v35, %v1054_v0  ;;  %v914_v0 = vpack.c.bf16 %v468_v63, %v467_v62  ;;  %v453_v35 = vld [vmem:[%s1241_s5] sm:$0xff] }
  0xa3   :  { %v57_v40 = vmul.f32 %v677_v38, %v49_v36  ;;  %v455_v36 = vld [vmem:[%s1240_s6] sm:$0xff] }
  0xa4   :  { %v992_v37 = vpop.eup %991 }
  0xa5   :  { %v50_v39 = vmul.f32 %v992_v37, %v1059_v1  ;;  %v469_v1 = vld [vmem:[%s1238_s7 + $0x60] sm:$0xff] }
  0xa7   :  { %v58_v41 = vmul.f32 %v677_v38, %v50_v39 }
  0xa9   :  { %v59_v42 = vpack.c.bf16 %v58_v41, %v57_v40 }
  0xab   :  { %749 = vmatprep.mubr.bf16.mxu0 %v59_v42  ;;  %815 = vmatmul.mubr.bf16.vlgmr.msra.gmra.mrb[0].mxu1 %v59_v42 }
  0xac   :  { %750 = vmatmul.mubr.bf16.vlgmr.msra.gmra.mrb[0].mxu0 %v59_v42  ;;  %403 = vmatpush1.bf16.msra.mxu1 %v986_v44 }
  0xad   :  { %819 = vmatpush3.bf16.xpose.msra.mxu0 %v985_v43  ;;  %820 = vmatprep.mubr.msk.bf16.mxu0 %vm994_vm0, %v993_v2  ;;  %v470_v2 = vld [vmem:[%s1238_s7 + $0x68] sm:$0xff] }
  0xae   :  { %434 = vmatprep.mubr.bf16.mxu1 %v995_v49  ;;  %927 = vmatprep.subr.bf16.mxu1 %v894_v48  ;;  %v918_v3 = vpack.c.bf16 %v470_v2, %v469_v1 }
  0xaf   :  { %895 = vmatprep.subr.bf16.mxu0 %v894_v48 }
  0xb4   :  { %821 = vmatmul.mubr.bf16.vlgmr.msra.gmra.mrb[4].mxu0 %v59_v42 }
  0xb5   :  { %897 = vmatpush3.bf16.msra.mxu0 %v894_v48 }
  0xb6   :  { %899 = vmatprep.subr.bf16.mxu0 %v898_v52 }
  0xb9   :  { %901 = vmatpush3.bf16.msra.mxu0 %v898_v52 }
  0xba   :  { %903 = vmatprep.subr.bf16.mxu0 %v902_v55 }
  0xbd   :  { %905 = vmatpush3.bf16.msra.mxu0 %v902_v55 }
  0xbe   :  { %907 = vmatprep.subr.bf16.mxu0 %v906_v58 }
  0xc1   :  { %909 = vmatpush3.bf16.msra.mxu0 %v906_v58 }
  0xc2   :  { %911 = vmatprep.subr.bf16.mxu0 %v910_v61 }
  0xc5   :  { %913 = vmatpush3.bf16.msra.mxu0 %v910_v61 }
  0xc6   :  { %915 = vmatprep.subr.bf16.mxu0 %v914_v0 }
  0xc9   :  { %917 = vmatpush3.bf16.msra.mxu0 %v914_v0 }
  0xca   :  { %919 = vmatprep.subr.bf16.mxu0 %v918_v3 }
  0xcd   :  { %921 = vmatpush3.bf16.msra.mxu0 %v918_v3 }
  0xce   :  { %923 = vmatprep.subr.bf16.mxu0 %v922_v6 }
  0xd1   :  { %925 = vmatpush3.bf16.msra.mxu0 %v922_v6 }
 0x17e   :  { %v329_v7 = vpop.f32.mrb[0].mxu1 }
 0x17f   :  { %v286_v8 = vpop.f32.mrb[0].mxu0  ;;  %v816_v9 = vpop.f32.mrb[1].mxu1 }
 0x180   :  { %v288_v10 = vpop.f32.mrb[1].mxu0  ;;  %v332_v11 = vpop.f32.mrb[2].mxu1 }
 0x181   :  { %v290_v12 = vpop.f32.mrb[2].mxu0  ;;  %v817_v13 = vpop.f32.mrb[3].mxu1  ;;  %v564_v41 = vmul.f32 %v453_v35, %v288_v10 }
 0x182   :  { %v292_v14 = vpop.f32.mrb[3].mxu0 }
 0x183   :  { %v565_v38 = vmul.f32 %v454_v33, %v292_v14 }
 0x187   :  { %v378_v15 = vpop.f32.mrb[4].mxu0 }
 0x188   :  { %v822_v16 = vpop.f32.mrb[5].mxu0 }
 0x189   :  { %v381_v17 = vpop.f32.mrb[6].mxu0 }
 0x18a   :  { %v385_v18 = vpack.c.bf16 %v381_v17, %v378_v15  ;;  %v823_v19 = vpop.f32.mrb[7].mxu0 }
 0x18c   :  { %705 = vmatmul.mubr.msk.bf16.vlgmr.msra.gmra.mrb[4].mxu1 %vm398_vm1, %v385_v18 }
 0x18d   :  { %929 = vmatpush3.bf16.msra.mxu1 %v894_v48  ;;  %891 = vmatprep.mubr.f32.mxu1 %v288_v10 }
 0x18e   :  { %931 = vmatprep.subr.bf16.mxu1 %v898_v52 }
 0x191   :  { %933 = vmatpush3.bf16.msra.mxu1 %v898_v52 }
 0x192   :  { %935 = vmatprep.subr.bf16.mxu1 %v902_v55 }
 0x195   :  { %937 = vmatpush3.bf16.msra.mxu1 %v902_v55 }
 0x196   :  { %939 = vmatprep.subr.bf16.mxu1 %v906_v58 }
 0x199   :  { %941 = vmatpush3.bf16.msra.mxu1 %v906_v58 }
 0x19a   :  { %943 = vmatprep.subr.bf16.mxu1 %v910_v61 }
 0x19d   :  { %945 = vmatpush3.bf16.msra.mxu1 %v910_v61 }
 0x19e   :  { %947 = vmatprep.subr.bf16.mxu1 %v914_v0 }
 0x1a1   :  { %949 = vmatpush3.bf16.msra.mxu1 %v914_v0 }
 0x1a2   :  { %951 = vmatprep.subr.bf16.mxu1 %v918_v3 }
 0x1a5   :  { %953 = vmatpush3.bf16.msra.mxu1 %v918_v3 }
 0x1a6   :  { %955 = vmatprep.subr.bf16.mxu1 %v922_v6 }
 0x1a9   :  { %957 = vmatpush3.bf16.msra.mxu1 %v922_v6 }
 0x1ac   :  { %892 = vmatmul.mubr.f32.vlgmr.msra.gmra.mrb[8].mxu1 %v292_v14 }
 0x25f   :  { %v436_v20 = vpop.f32.mrb[4].mxu1 }
 0x260   :  { %v445_v21 = vmul.f32 2.0, %v436_v20  ;;  %v438_v22 = vpop.f32.mrb[5].mxu1 }
 0x261   :  { %v449_v23 = vmul.f32 2.0, %v438_v22  ;;  %v440_v24 = vpop.f32.mrb[6].mxu1 }
 0x262   :  { %v447_v25 = vadd.f32 %v445_v21, %v286_v8  ;;  %v446_v26 = vmul.f32 2.0, %v440_v24  ;;  %v442_v27 = vpop.f32.mrb[7].mxu1 }
 0x263   :  { %v451_v28 = vadd.f32 %v449_v23, %v329_v7  ;;  %v450_v29 = vmul.f32 2.0, %v442_v27 }
 0x264   :  { %v448_v30 = vadd.f32 %v446_v26, %v290_v12  ;;  %856 = vmatprep.mubr.f32.mxu0 %v447_v25  ;;  %v473_v50 = vmul.f32 %v453_v35, %v447_v25 }
 0x265   :  { %v452_v31 = vadd.f32 %v450_v29, %v332_v11 }
 0x266   :  { %857 = vmatmul.mubr.f32.vlgmr.msra.gmra.mrb[8].mxu0 %v448_v30  ;;  %v474_v47 = vmul.f32 %v454_v33, %v448_v30 }
 0x267   :  { %v731_v32 = vpack.c.bf16 %v452_v31, %v451_v28 }
 0x269   :  { %732 = vst [vmem:[%s1239_s10] sm:$0xff] %v731_v32  }
 0x27f   :  { %v893_v37 = vpop.f32.mrb[8].mxu1 }
 0x280   :  { %v642_v39 = vmul.f32 %v893_v37, %v456_v34  ;;  %v632_v40 = vpop.f32.mrb[9].mxu1 }
 0x281   :  { %v641_v42 = vmul.f32 %v632_v40, %v455_v36 }
 0x282   :  { %v644_v43 = vadd.f32 %v642_v39, %v565_v38 }
 0x283   :  { %v643_v44 = vadd.f32 %v641_v42, %v564_v41 }
 0x285   :  { %v726_v45 = vpack.c.bf16 %v644_v43, %v643_v44 }
 0x287   :  { %727 = vst [vmem:[%s1242_s9] sm:$0xff] %v726_v45  }
 0x339   :  { %v858_v46 = vpop.f32.mrb[8].mxu0 }
 0x33a   :  { %v551_v48 = vmul.f32 %v858_v46, %v456_v34  ;;  %v541_v49 = vpop.f32.mrb[9].mxu0 }
 0x33b   :  { %v550_v51 = vmul.f32 %v541_v49, %v455_v36 }
 0x33c   :  { %v553_v52 = vadd.f32 %v551_v48, %v474_v47 }
 0x33d   :  { %v552_v53 = vadd.f32 %v550_v51, %v473_v50 }
 0x33f   :  { %v721_v54 = vpack.c.bf16 %v553_v52, %v552_v53 }
 0x341   :  { %722 = vst [vmem:[%s1243_s8] sm:$0xff] %v721_v54  }

// kernel: lora_model_forward.8
= control target key start
LH: loop header
LB: loop body
LE: loop exit
PB: predicated region body
PF: predicated region fallthrough
CT: control target
= control target key end

     0   :  { %vm32_vm0 = vcmask 261120   ;;  %v1392_v0 = vmov 0.0   ;;  %vm1393_vm1 = vmmov 0   ;;  %v21_v7 = vlaneseq  ;;  %s1394_s28 = smov 96   ;;  %s1395_s18 = smov 64   ;;  %s1692_s1 = inlined_call_operand.vmem [shape: bf16[2,8,128], index: 1, kind: input, shape index: {}]   ;;  %s1693_s0 = inlined_call_operand.vmem [shape: bf16[2,8,128], index: 0, kind: input, shape index: {}]   ;;  %s1694_s2 = inlined_call_operand.vmem [shape: bf16[2,8,128], index: 2, kind: input, shape index: {}]   ;;  %s1695_s3 = inlined_call_operand.vmem [shape: bf16[128,128], index: 3, kind: input, shape index: {}]   ;;  %s1696_s4 = inlined_call_operand.vmem [shape: f32[16,128], index: 4, kind: input, shape index: {}]   ;;  %s1697_s5 = inlined_call_operand.vmem [shape: f32[16,128], index: 5, kind: output, shape index: {}]  }
   0x1   :  { %1213 = vmatprep.subr.bf16.mxu1 %v1392_v0  ;;  %v28_v1 = vld [vmem:[%s1692_s1] sm:$0xf]  ;;  %1215 = vmatprep.mubr.msk.bf16.mxu1 %vm1393_vm1, %v1392_v0  ;;  %v29_v3 = vld [vmem:[%s1692_s1 + $0x4] sm:$0xf]  ;;  %vm129_vm3 = vcmask 64512   ;;  %vm157_vm4 = vcmask 1043456  }
   0x2   :  { %v37_v2 = vsel %vm32_vm0, %v28_v1, 0  ;;  %1261 = vmatprep.subr.bf16.mxu0 %v1392_v0  ;;  %1263 = vmatprep.mubr.msk.bf16.mxu0 %vm1393_vm1, %v1392_v0  ;;  %v26_v4 = vld [vmem:[%s1693_s0] sm:$0xf]  ;;  %v83_v5 = vsel %vm32_vm0, %v29_v3, 0  ;;  %v27_v6 = vld [vmem:[%s1693_s0 + $0x4] sm:$0xf] }
   0x3   :  { %1214 = vmatpush3.bf16.xpose.msra.mxu1 %v37_v2  ;;  %v22_v8 = vshrl.u32 %v21_v7, 7  ;;  %v24_v9 = vand.u32 127, %v21_v7  ;;  %v1334_v25 = vld [vmem:[%s1692_s1] ss:$0 sps:$4 sm:$0xff]   ;;  %v1336_v37 = vld [vmem:[%s1692_s1 + $0x4] ss:$0 sps:$4 sm:$0xff]  }
   0x4   :  { %1219 = vmatprep.subr.bf16.mxu1 %v1392_v0  ;;  %v1335_v36 = vld [vmem:[%s1693_s0] ss:$0 sps:$4 sm:$0xff]   ;;  %v1337_v40 = vld [vmem:[%s1693_s0 + $0x4] ss:$0 sps:$4 sm:$0xff]   ;;  %s1396_s7 = smov 32   ;;  %vm502_vm5 = vcmask 523520  }
   0x5   :  { %vm1455_vm2 = vcmp.le.s32.totalorder %v24_v9, %v22_v8  ;;  %v30_v38 = vld [vmem:[%s1694_s2] sm:$0xf]  ;;  %v31_v44 = vld [vmem:[%s1694_s2 + $0x4] sm:$0xf]  ;;  %vm757_vm6 = vcmask 785920   ;;  %vm1012_vm7 = vcmask 1048320  }
   0x6   :  { %v159_v39 = vsel %vm157_vm4, %v30_v38, 0  ;;  %v205_v47 = vsel %vm157_vm4, %v31_v44, 0 }
   0xa   :  { %1216 = vmatmul.mubr.msk.bf16.vlgmr.msra.gmra.mrb[0].mxu1 %vm32_vm0, %v26_v4 }
   0xb   :  { %1220 = vmatpush3.bf16.xpose.msra.mxu1 %v83_v5  ;;  %1221 = vmatprep.mubr.msk.bf16.mxu1 %vm1393_vm1, %v1392_v0 }
   0xc   :  { %1225 = vmatprep.subr.bf16.mxu1 %v1392_v0 }
  0x12   :  { %1222 = vmatmul.mubr.msk.bf16.vlgmr.msra.gmra.mrb[4].mxu1 %vm32_vm0, %v27_v6 }
  0x13   :  { %1227 = vmatprep.mubr.msk.bf16.mxu1 %vm1393_vm1, %v1392_v0  ;;  %1226 = vmatpush3.bf16.msra.mxu1 %v159_v39 }
  0x14   :  { %1231 = vmatprep.subr.bf16.mxu1 %v1392_v0 }
  0xdd   :  { %v73_v10 = vpop.f32.mrb[0].mxu1 }
  0xde   :  { %v125_v12 = vmul.f32 0.17677669, %v73_v10  ;;  %v1217_v13 = vpop.f32.mrb[1].mxu1 }
  0xdf   :  { %v76_v14 = vpop.f32.mrb[2].mxu1 }
  0xe0   :  { %v1218_v15 = vpop.f32.mrb[3].mxu1  ;;  %v127_v16 = vsel %vm1455_vm2, %v125_v12, -1e+30 }
  0xe1   :  { %v130_v17 = vsel %vm129_vm3, %v127_v16, -inf }
  0xe2   :  { %131 = vmax.xlane.f32.xlu0 %v130_v17 }
  0xe5   :  { %v119_v18 = vpop.f32.mrb[4].mxu1 }
  0xe6   :  { %v126_v19 = vmul.f32 0.17677669, %v119_v18  ;;  %v1223_v20 = vpop.f32.mrb[5].mxu1  ;;  %v1338_v18 = vld [vmem:[%s1694_s2 + $0x4] ss:$0 sps:$4 sm:$0xff]  }
  0xe7   :  { %v122_v21 = vpop.f32.mrb[6].mxu1  ;;  %v1342_v20 = vld [vmem:[%s1692_s1 + $0x4] ss:$0 sps:$4 sm:$0xff]  }
  0xe8   :  { %v1224_v22 = vpop.f32.mrb[7].mxu1  ;;  %v128_v23 = vsel %vm1455_vm2, %v126_v19, -1e+30  ;;  %v1339_v19 = vld [vmem:[%s1692_s1] ss:$0 sps:$4 sm:$0xff]  }
  0xe9   :  { %v133_v24 = vsel %vm129_vm3, %v128_v23, -inf  ;;  %v1343_v21 = vld [vmem:[%s1693_s0 + $0x4] ss:$0 sps:$4 sm:$0xff]  }
  0xea   :  { %134 = vmax.xlane.f32.xlu0 %v133_v24 }
 0x100   :  { %263 = vrot.lane.b32.xlu0 %v1334_v25, %s1394_s28 }
 0x16f   :  { %v132_v26 = vpop.xlane.xlu0 %131 }
 0x170   :  { %v136_v27 = vsub.f32 %v127_v16, %v132_v26 }
 0x172   :  { %v138_v28 = vmul.f32 1.442695, %v136_v27 }
 0x174   :  { %1360 = vpow2.f32 %v138_v28 }
 0x177   :  { %v135_v29 = vpop.xlane.xlu0 %134 }
 0x178   :  { %v137_v30 = vsub.f32 %v128_v23, %v135_v29 }
 0x17a   :  { %v140_v31 = vmul.f32 1.442695, %v137_v30 }
 0x17b   :  { %v264_v50 = vpop.permute.xlu0 %263 }
 0x17c   :  { %1362 = vpow2.f32 %v140_v31  ;;  %v269_v53 = vsel %vm32_vm0, %v264_v50, 0 }
 0x17e   :  { %v1361_v32 = vpop.eup %1360 }
 0x17f   :  { %v142_v33 = vsel %vm129_vm3, %v1361_v32, 0.0 }
 0x180   :  { %143 = vadd.xlane.f32.xlu1 %v142_v33 }
 0x186   :  { %v1363_v34 = vpop.eup %1362 }
 0x187   :  { %v145_v35 = vsel %vm129_vm3, %v1363_v34, 0.0 }
 0x188   :  { %146 = vadd.xlane.f32.xlu1 %v145_v35  ;;  %v1340_v35 = vld [vmem:[%s1694_s2] ss:$0 sps:$4 sm:$0xff]  }
 0x199   :  { %258 = vrot.lane.b32.xlu1 %v1335_v36, %s1394_s28  ;;  %v1341_v36 = vld [vmem:[%s1693_s0] ss:$0 sps:$4 sm:$0xff]  }
 0x19d   :  { %319 = vrot.lane.b32.xlu1 %v1336_v37, %s1394_s28 }
 0x1a1   :  { %314 = vrot.lane.b32.xlu1 %v1337_v40, %s1394_s28 }
 0x20d   :  { %v144_v41 = vpop.xlane.xlu1 %143 }
 0x20e   :  { %1364 = vrcp.f32 %v144_v41 }
 0x215   :  { %v147_v42 = vpop.xlane.xlu1 %146 }
 0x216   :  { %1366 = vrcp.f32 %v147_v42 }
 0x218   :  { %v1365_v43 = vpop.eup %1364 }
 0x219   :  { %v150_v45 = vmul.f32 %v1365_v43, %v1361_v32  ;;  %v259_v52 = vpop.permute.xlu1 %258 }
 0x21b   :  { %v152_v46 = vpack.c.bf16 %v150_v45, %v150_v45 }
 0x21d   :  { %1228 = vmatmul.mubr.msk.bf16.vlgmr.msra.gmra.mrb[8].mxu1 %vm129_vm3, %v152_v46  ;;  %v320_v54 = vpop.permute.xlu1 %319 }
 0x21e   :  { %1232 = vmatpush3.bf16.msra.mxu1 %v205_v47  ;;  %1233 = vmatprep.mubr.msk.bf16.mxu1 %vm1393_vm1, %v1392_v0  ;;  %v325_v55 = vsel %vm32_vm0, %v320_v54, 0 }
 0x21f   :  { %1237 = vmatprep.subr.bf16.mxu1 %v1392_v0 }
 0x220   :  { %v1367_v48 = vpop.eup %1366 }
 0x221   :  { %v151_v49 = vmul.f32 %v1367_v48, %v1363_v34  ;;  %v315_v56 = vpop.permute.xlu1 %314 }
 0x223   :  { %v153_v51 = vpack.c.bf16 %v151_v49, %v151_v49 }
 0x225   :  { %1234 = vmatmul.mubr.msk.bf16.vlgmr.msra.gmra.mrb[12].mxu1 %vm129_vm3, %v153_v51 }
 0x226   :  { %1239 = vmatprep.mubr.msk.bf16.mxu1 %vm1393_vm1, %v1392_v0 }
 0x227   :  { %1238 = vmatpush3.bf16.xpose.msra.mxu1 %v269_v53 }
 0x228   :  { %1243 = vmatprep.subr.bf16.mxu1 %v1392_v0 }
 0x22e   :  { %1240 = vmatmul.mubr.msk.bf16.vlgmr.msra.gmra.mrb[16].mxu1 %vm32_vm0, %v259_v52 }
 0x22f   :  { %1244 = vmatpush3.bf16.xpose.msra.mxu1 %v325_v55  ;;  %1245 = vmatprep.mubr.msk.bf16.mxu1 %vm1393_vm1, %v1392_v0 }
 0x230   :  { %1249 = vmatprep.subr.bf16.mxu1 %v1392_v0 }
 0x236   :  { %1246 = vmatmul.mubr.msk.bf16.vlgmr.msra.gmra.mrb[20].mxu1 %vm32_vm0, %v315_v56 }
 0x237   :  { %1251 = vmatprep.mubr.msk.bf16.mxu1 %vm1393_vm1, %v1392_v0 }
 0x2f0   :  { %v195_v57 = vpop.f32.mrb[8].mxu1 }
 0x2f1   :  { %v1229_v58 = vpop.f32.mrb[9].mxu1 }
 0x2f2   :  { %v198_v59 = vpop.f32.mrb[10].mxu1 }
 0x2f3   :  { %v1230_v60 = vpop.f32.mrb[11].mxu1 }
 0x2f8   :  { %v241_v61 = vpop.f32.mrb[12].mxu1 }
 0x2f9   :  { %v247_v62 = vpack.c.bf16 %v241_v61, %v195_v57  ;;  %v1235_v63 = vpop.f32.mrb[13].mxu1 }
 0x2fa   :  { %v244_v1 = vpop.f32.mrb[14].mxu1 }
 0x2fb   :  { %248 = vst.msk [vmem:[#allocation2] sm:$0xff] %vm32_vm0, %v247_v62  ;;  %v1236_v2 = vpop.f32.mrb[15].mxu1 }
 0x301   :  { %v305_v3 = vpop.f32.mrb[16].mxu1 }
 0x302   :  { %v367_v4 = vmul.f32 0.17677669, %v305_v3  ;;  %v1241_v5 = vpop.f32.mrb[17].mxu1 }
 0x303   :  { %v308_v6 = vpop.f32.mrb[18].mxu1 }
 0x304   :  { %v1242_v7 = vpop.f32.mrb[19].mxu1  ;;  %v369_v8 = vsel %vm1455_vm2, %v367_v4, -1e+30 }
 0x305   :  { %v371_v9 = vsel %vm129_vm3, %v369_v8, -inf }
 0x306   :  { %372 = vmax.xlane.f32.xlu0 %v371_v9 }
 0x309   :  { %v361_v10 = vpop.f32.mrb[20].mxu1 }
 0x30a   :  { %v368_v12 = vmul.f32 0.17677669, %v361_v10  ;;  %v1247_v13 = vpop.f32.mrb[21].mxu1 }
 0x30b   :  { %v364_v14 = vpop.f32.mrb[22].mxu1  ;;  %v1345_v13 = vld [vmem:[%s1694_s2 + $0x4] ss:$0 sps:$4 sm:$0xff]  }
 0x30c   :  { %v1248_v15 = vpop.f32.mrb[23].mxu1  ;;  %v370_v16 = vsel %vm1455_vm2, %v368_v12, -1e+30  ;;  %v1346_v14 = vld [vmem:[%s1692_s1] ss:$0 sps:$4 sm:$0xff]  }
 0x30d   :  { %v374_v17 = vsel %vm129_vm3, %v370_v16, -inf  ;;  %v1347_v15 = vld [vmem:[%s1692_s1 + $0x4] ss:$0 sps:$4 sm:$0xff]  }
 0x30e   :  { %375 = vmax.xlane.f32.xlu1 %v374_v17 }
 0x31f   :  { %449 = vrot.lane.b32.xlu1 %v1338_v18, %s1394_s28 }
 0x323   :  { %518 = vrot.lane.b32.xlu1 %v1339_v19, %s1395_s18 }
 0x327   :  { %574 = vrot.lane.b32.xlu1 %v1342_v20, %s1395_s18 }
 0x32b   :  { %569 = vrot.lane.b32.xlu1 %v1343_v21, %s1395_s18 }
 0x393   :  { %v373_v22 = vpop.xlane.xlu0 %372 }
 0x394   :  { %v377_v23 = vsub.f32 %v369_v8, %v373_v22 }
 0x396   :  { %v379_v24 = vmul.f32 1.442695, %v377_v23 }
 0x398   :  { %1368 = vpow2.f32 %v379_v24 }
 0x39b   :  { %v376_v25 = vpop.xlane.xlu1 %375 }
 0x39c   :  { %v378_v26 = vsub.f32 %v370_v16, %v376_v25  ;;  %v1349_v16 = vld [vmem:[%s1693_s0 + $0x4] ss:$0 sps:$4 sm:$0xff]  }
 0x39e   :  { %v381_v27 = vmul.f32 1.442695, %v378_v26 }
 0x39f   :  { %v450_v32 = vpop.permute.xlu1 %449 }
 0x3a0   :  { %1370 = vpow2.f32 %v381_v27  ;;  %v455_v44 = vsel %vm157_vm4, %v450_v32, 0  ;;  %v1344_v27 = vld [vmem:[%s1694_s2] ss:$0 sps:$4 sm:$0xff]  }
 0x3a2   :  { %v1369_v28 = vpop.eup %1368 }
 0x3a3   :  { %v383_v29 = vsel %vm129_vm3, %v1369_v28, 0.0  ;;  %v519_v33 = vpop.permute.xlu1 %518 }
 0x3a4   :  { %384 = vadd.xlane.f32.xlu0 %v383_v29  ;;  %v524_v34 = vsel %vm32_vm0, %v519_v33, 0 }
 0x3a5   :  { %1262 = vmatpush3.bf16.xpose.msra.mxu0 %v524_v34 }
 0x3a6   :  { %1273 = vmatprep.subr.bf16.mxu0 %v1392_v0 }
 0x3a7   :  { %v575_v48 = vpop.permute.xlu1 %574 }
 0x3a8   :  { %v580_v50 = vsel %vm32_vm0, %v575_v48, 0 }
 0x3aa   :  { %v1371_v30 = vpop.eup %1370 }
 0x3ab   :  { %v386_v31 = vsel %vm129_vm3, %v1371_v30, 0.0  ;;  %v570_v51 = vpop.permute.xlu1 %569 }
 0x3ac   :  { %387 = vadd.xlane.f32.xlu0 %v386_v31 }
 0x3c2   :  { %398 = vrot.lane.b32.xlu0 %v1340_v35, %s1394_s28 }
 0x3c6   :  { %513 = vrot.lane.b32.xlu0 %v1341_v36, %s1395_s18 }
 0x431   :  { %v385_v37 = vpop.xlane.xlu0 %384 }
 0x432   :  { %1372 = vrcp.f32 %v385_v37 }
 0x439   :  { %v388_v38 = vpop.xlane.xlu0 %387 }
 0x43a   :  { %1374 = vrcp.f32 %v388_v38 }
 0x43c   :  { %v1373_v39 = vpop.eup %1372 }
 0x43d   :  { %v391_v40 = vmul.f32 %v1373_v39, %v1369_v28  ;;  %v399_v41 = vpop.permute.xlu0 %398 }
 0x43e   :  { %v404_v42 = vsel %vm157_vm4, %v399_v41, 0 }
 0x43f   :  { %1250 = vmatpush3.bf16.msra.mxu1 %v404_v42  ;;  %v393_v43 = vpack.c.bf16 %v391_v40, %v391_v40 }
 0x440   :  { %1255 = vmatprep.subr.bf16.mxu1 %v1392_v0 }
 0x441   :  { %v514_v45 = vpop.permute.xlu0 %513 }
 0x442   :  { %1252 = vmatmul.mubr.msk.bf16.vlgmr.msra.gmra.mrb[24].mxu1 %vm129_vm3, %v393_v43  ;;  %1264 = vmatmul.mubr.msk.bf16.vlgmr.msra.gmra.mrb[0].mxu0 %vm32_vm0, %v514_v45 }
 0x443   :  { %1256 = vmatpush3.bf16.msra.mxu1 %v455_v44  ;;  %1257 = vmatprep.mubr.msk.bf16.mxu1 %vm1393_vm1, %v1392_v0 }
 0x444   :  { %v1375_v46 = vpop.eup %1374  ;;  %1267 = vmatprep.subr.bf16.mxu1 %v1392_v0  ;;  %1275 = vmatprep.mubr.msk.bf16.mxu0 %vm1393_vm1, %v1392_v0 }
 0x445   :  { %v392_v47 = vmul.f32 %v1375_v46, %v1371_v30  ;;  %v1348_v30 = vld [vmem:[%s1693_s0] ss:$0 sps:$4 sm:$0xff]  }
 0x447   :  { %v394_v49 = vpack.c.bf16 %v392_v47, %v392_v47 }
 0x44a   :  { %1258 = vmatmul.mubr.msk.bf16.vlgmr.msra.gmra.mrb[28].mxu1 %vm129_vm3, %v394_v49 }
 0x44b   :  { %1269 = vmatprep.mubr.msk.bf16.mxu1 %vm1393_vm1, %v1392_v0 }
 0x44c   :  { %1268 = vmatpush3.bf16.xpose.msra.mxu1 %v580_v50 }
 0x44d   :  { %1279 = vmatprep.subr.bf16.mxu1 %v1392_v0 }
 0x453   :  { %1270 = vmatmul.mubr.msk.bf16.vlgmr.msra.gmra.mrb[32].mxu1 %vm32_vm0, %v570_v51 }
 0x454   :  { %1281 = vmatprep.mubr.msk.bf16.mxu1 %vm1393_vm1, %v1392_v0 }
 0x515   :  { %v1562_v52 = vpop.f32.mrb[24].mxu1  ;;  %v560_v53 = vpop.f32.mrb[0].mxu0 }
 0x516   :  { %v622_v54 = vmul.f32 0.17677669, %v560_v53  ;;  %v1253_v55 = vpop.f32.mrb[25].mxu1  ;;  %v1265_v56 = vpop.f32.mrb[1].mxu0 }
 0x517   :  { %v443_v57 = vpop.f32.mrb[26].mxu1  ;;  %v563_v58 = vpop.f32.mrb[2].mxu0 }
 0x518   :  { %v1254_v59 = vpop.f32.mrb[27].mxu1  ;;  %v624_v60 = vsel %vm1455_vm2, %v622_v54, -1e+30  ;;  %v1266_v61 = vpop.f32.mrb[3].mxu0 }
 0x519   :  { %v626_v62 = vsel %vm129_vm3, %v624_v60, -inf }
 0x51a   :  { %627 = vmax.xlane.f32.xlu0 %v626_v62 }
 0x51d   :  { %v1567_v63 = vpop.f32.mrb[28].mxu1 }
 0x51e   :  { %v497_v1 = vpack.c.bf16 %v1567_v63, %v1562_v52  ;;  %v1259_v2 = vpop.f32.mrb[29].mxu1 }
 0x51f   :  { %v494_v3 = vpop.f32.mrb[30].mxu1 }
 0x520   :  { %v1260_v4 = vpop.f32.mrb[31].mxu1 }
 0x526   :  { %v616_v5 = vpop.f32.mrb[32].mxu1 }
 0x527   :  { %v623_v6 = vmul.f32 0.17677669, %v616_v5  ;;  %v1271_v7 = vpop.f32.mrb[33].mxu1 }
 0x528   :  { %v619_v8 = vpop.f32.mrb[34].mxu1 }
 0x529   :  { %v1272_v9 = vpop.f32.mrb[35].mxu1  ;;  %v625_v10 = vsel %vm1455_vm2, %v623_v6, -1e+30 }
 0x52a   :  { %v629_v12 = vsel %vm129_vm3, %v625_v10, -inf }
 0x52b   :  { %630 = vmax.xlane.f32.xlu1 %v629_v12 }
 0x53c   :  { %704 = vrot.lane.b32.xlu1 %v1345_v13, %s1395_s18 }
 0x540   :  { %773 = vrot.lane.b32.xlu1 %v1346_v14, %s1396_s7 }
 0x544   :  { %829 = vrot.lane.b32.xlu1 %v1347_v15, %s1396_s7 }
 0x548   :  { %824 = vrot.lane.b32.xlu1 %v1349_v16, %s1396_s7 }
 0x5a7   :  { %v628_v17 = vpop.xlane.xlu0 %627 }
 0x5a8   :  { %v632_v18 = vsub.f32 %v624_v60, %v628_v17 }
 0x5aa   :  { %v634_v19 = vmul.f32 1.442695, %v632_v18 }
 0x5ac   :  { %1376 = vpow2.f32 %v634_v19 }
 0x5b6   :  { %v1377_v20 = vpop.eup %1376 }
 0x5b7   :  { %v638_v21 = vsel %vm129_vm3, %v1377_v20, 0.0 }
 0x5b8   :  { %639 = vadd.xlane.f32.xlu0 %v638_v21  ;;  %v631_v22 = vpop.xlane.xlu1 %630 }
 0x5b9   :  { %v633_v23 = vsub.f32 %v625_v10, %v631_v22  ;;  %v1350_v10 = vld [vmem:[%s1694_s2 + $0x4] ss:$0 sps:$4 sm:$0xff]   ;;  %v1351_v22 = vld [vmem:[%s1694_s2] ss:$0 sps:$4 sm:$0xff]  }
 0x5bb   :  { %v636_v24 = vmul.f32 1.442695, %v633_v23 }
 0x5bc   :  { %v705_v28 = vpop.permute.xlu1 %704 }
 0x5bd   :  { %1378 = vpow2.f32 %v636_v24  ;;  %v710_v29 = vsel %vm157_vm4, %v705_v28, 0 }
 0x5be   :  { %1280 = vmatpush3.bf16.msra.mxu1 %v710_v29 }
 0x5bf   :  { %1291 = vmatprep.subr.bf16.mxu1 %v1392_v0 }
 0x5c0   :  { %v774_v37 = vpop.permute.xlu1 %773 }
 0x5c1   :  { %v779_v42 = vsel %vm32_vm0, %v774_v37, 0  ;;  %v1356_v37 = vld [vmem:[%s1695_s3 + $0x20] sm:$0xff]  }
 0x5c4   :  { %v830_v40 = vpop.permute.xlu1 %829 }
 0x5c5   :  { %v835_v43 = vsel %vm32_vm0, %v830_v40, 0  ;;  %v1359_v40 = vld [vmem:[%s1695_s3 + $0x38] sm:$0xff]  }
 0x5c7   :  { %v1379_v25 = vpop.eup %1378 }
 0x5c8   :  { %v641_v26 = vsel %vm129_vm3, %v1379_v25, 0.0  ;;  %v825_v46 = vpop.permute.xlu1 %824 }
 0x5c9   :  { %642 = vadd.xlane.f32.xlu0 %v641_v26 }
 0x5df   :  { %653 = vrot.lane.b32.xlu0 %v1344_v27, %s1395_s18 }
 0x5e3   :  { %768 = vrot.lane.b32.xlu0 %v1348_v30, %s1396_s7 }
 0x645   :  { %v640_v31 = vpop.xlane.xlu0 %639 }
 0x646   :  { %1380 = vrcp.f32 %v640_v31 }
 0x650   :  { %v1381_v32 = vpop.eup %1380 }
 0x651   :  { %v646_v34 = vmul.f32 %v1381_v32, %v1377_v20 }
 0x653   :  { %v648_v38 = vpack.c.bf16 %v646_v34, %v646_v34  ;;  %v1353_v34 = vld [vmem:[%s1695_s3 + $0x8] sm:$0xff]  }
 0x656   :  { %v643_v33 = vpop.xlane.xlu0 %642 }
 0x657   :  { %1382 = vrcp.f32 %v643_v33  ;;  %v1352_v33 = vld [vmem:[%s1695_s3] sm:$0xff]  }
 0x65a   :  { %v654_v35 = vpop.permute.xlu0 %653 }
 0x65b   :  { %v659_v36 = vsel %vm157_vm4, %v654_v35, 0  ;;  %v1354_v35 = vld [vmem:[%s1695_s3 + $0x10] sm:$0xff]  }
 0x65c   :  { %1274 = vmatpush3.bf16.msra.mxu0 %v659_v36  ;;  %v1355_v36 = vld [vmem:[%s1695_s3 + $0x18] sm:$0xff]  }
 0x65d   :  { %1285 = vmatprep.subr.bf16.mxu0 %v1392_v0 }
 0x65e   :  { %v769_v45 = vpop.permute.xlu0 %768 }
 0x65f   :  { %1276 = vmatmul.mubr.msk.bf16.vlgmr.msra.gmra.mrb[4].mxu0 %vm129_vm3, %v648_v38  ;;  %v1357_v38 = vld [vmem:[%s1695_s3 + $0x28] sm:$0xff]  }
 0x660   :  { %1287 = vmatprep.mubr.msk.bf16.mxu0 %vm1393_vm1, %v1392_v0 }
 0x661   :  { %v1383_v39 = vpop.eup %1382 }
 0x662   :  { %v647_v41 = vmul.f32 %v1383_v39, %v1379_v25  ;;  %v1358_v39 = vld [vmem:[%s1695_s3 + $0x30] sm:$0xff]  }
 0x664   :  { %v649_v44 = vpack.c.bf16 %v647_v41, %v647_v41 }
 0x665   :  { %1286 = vmatpush3.bf16.xpose.msra.mxu0 %v779_v42 }
 0x666   :  { %1282 = vmatmul.mubr.msk.bf16.vlgmr.msra.gmra.mrb[36].mxu1 %vm129_vm3, %v649_v44  ;;  %1297 = vmatprep.subr.bf16.mxu0 %v1392_v0 }
 0x667   :  { %1292 = vmatpush3.bf16.xpose.msra.mxu1 %v835_v43  ;;  %1293 = vmatprep.mubr.msk.bf16.mxu1 %vm1393_vm1, %v1392_v0 }
 0x668   :  { %1303 = vmatprep.subr.bf16.mxu1 %v1392_v0 }
 0x66c   :  { %1288 = vmatmul.mubr.msk.bf16.vlgmr.msra.gmra.mrb[8].mxu0 %vm32_vm0, %v769_v45 }
 0x66d   :  { %1299 = vmatprep.mubr.msk.bf16.mxu0 %vm1393_vm1, %v1392_v0 }
 0x66e   :  { %1294 = vmatmul.mubr.msk.bf16.vlgmr.msra.gmra.mrb[40].mxu1 %vm32_vm0, %v825_v46 }
 0x66f   :  { %1305 = vmatprep.mubr.msk.bf16.mxu1 %vm1393_vm1, %v1392_v0 }
 0x732   :  { %v695_v47 = vpop.f32.mrb[4].mxu0 }
 0x733   :  { %v1277_v48 = vpop.f32.mrb[5].mxu0 }
 0x734   :  { %v698_v49 = vpop.f32.mrb[6].mxu0 }
 0x735   :  { %v1278_v50 = vpop.f32.mrb[7].mxu0 }
 0x739   :  { %v746_v51 = vpop.f32.mrb[36].mxu1 }
 0x73a   :  { %v752_v53 = vpack.c.bf16 %v746_v51, %v695_v47  ;;  %v1283_v54 = vpop.f32.mrb[37].mxu1  ;;  %v1014_v51 = vld [vmem:[%s1696_s4] sm:$0xff] }
 0x73b   :  { %v749_v55 = vpop.f32.mrb[38].mxu1  ;;  %v1015_v54 = vld [vmem:[%s1696_s4 + $0x8] sm:$0xff] }
 0x73c   :  { %v1284_v56 = vpop.f32.mrb[39].mxu1 }
 0x73f   :  { %v815_v57 = vpop.f32.mrb[8].mxu0 }
 0x740   :  { %v877_v58 = vmul.f32 0.17677669, %v815_v57  ;;  %v1289_v59 = vpop.f32.mrb[9].mxu0 }
 0x741   :  { %v871_v60 = vpop.f32.mrb[40].mxu1  ;;  %v818_v61 = vpop.f32.mrb[10].mxu0 }
 0x742   :  { %v878_v62 = vmul.f32 0.17677669, %v871_v60  ;;  %v1290_v2 = vpop.f32.mrb[11].mxu0  ;;  %v879_v3 = vsel %vm1455_vm2, %v877_v58, -1e+30  ;;  %v1295_v4 = vpop.f32.mrb[41].mxu1 }
 0x743   :  { %v881_v5 = vsel %vm129_vm3, %v879_v3, -inf  ;;  %v874_v6 = vpop.f32.mrb[42].mxu1 }
 0x744   :  { %882 = vmax.xlane.f32.xlu0 %v881_v5  ;;  %v880_v7 = vsel %vm1455_vm2, %v878_v62, -1e+30  ;;  %v1296_v8 = vpop.f32.mrb[43].mxu1 }
 0x745   :  { %v884_v9 = vsel %vm129_vm3, %v880_v7, -inf }
 0x746   :  { %885 = vmax.xlane.f32.xlu1 %v884_v9 }
 0x757   :  { %959 = vrot.lane.b32.xlu1 %v1350_v10, %s1396_s7 }
 0x75b   :  { %499 = vrot.lane.b32.xlu1 %v497_v1, %s1396_s7 }
 0x75f   :  { %754 = vrot.lane.b32.xlu1 %v752_v53, %s1395_s18 }
 0x7d1   :  { %v883_v12 = vpop.xlane.xlu0 %882 }
 0x7d2   :  { %v887_v11 = vsub.f32 %v879_v3, %v883_v12 }
 0x7d3   :  { %v886_v13 = vpop.xlane.xlu1 %885 }
 0x7d4   :  { %v889_v14 = vmul.f32 1.442695, %v887_v11  ;;  %v888_v15 = vsub.f32 %v880_v7, %v886_v13 }
 0x7d6   :  { %1384 = vpow2.f32 %v889_v14  ;;  %v891_v16 = vmul.f32 1.442695, %v888_v15 }
 0x7d7   :  { %v960_v17 = vpop.permute.xlu1 %959 }
 0x7d8   :  { %1386 = vpow2.f32 %v891_v16  ;;  %v965_v18 = vsel %vm157_vm4, %v960_v17, 0 }
 0x7d9   :  { %1304 = vmatpush3.bf16.msra.mxu1 %v965_v18 }
 0x7db   :  { %v500_v19 = vpop.permute.xlu1 %499 }
 0x7dc   :  { %503 = vst.msk [vmem:[#allocation2] sm:$0xff] %vm502_vm5, %v500_v19 }
 0x7df   :  { %v755_v52 = vpop.permute.xlu1 %754 }
 0x7e0   :  { %v1385_v63 = vpop.eup %1384  ;;  %758 = vst.msk [vmem:[#allocation2] sm:$0xff] %vm757_vm6, %v755_v52 }
 0x7e1   :  { %v893_v1 = vsel %vm129_vm3, %v1385_v63, 0.0 }
 0x7e2   :  { %v1387_v20 = vpop.eup %1386  ;;  %894 = vadd.xlane.f32.xlu0 %v893_v1 }
 0x7e3   :  { %v896_v21 = vsel %vm129_vm3, %v1387_v20, 0.0 }
 0x7e6   :  { %897 = vadd.xlane.f32.xlu0 %v896_v21 }
 0x7fc   :  { %908 = vrot.lane.b32.xlu0 %v1351_v22, %s1396_s7 }
 0x86f   :  { %v895_v23 = vpop.xlane.xlu0 %894 }
 0x870   :  { %1388 = vrcp.f32 %v895_v23 }
 0x873   :  { %v898_v24 = vpop.xlane.xlu0 %897 }
 0x874   :  { %1390 = vrcp.f32 %v898_v24 }
 0x877   :  { %v909_v25 = vpop.permute.xlu0 %908 }
 0x878   :  { %v914_v26 = vsel %vm157_vm4, %v909_v25, 0 }
 0x879   :  { %1298 = vmatpush3.bf16.msra.mxu0 %v914_v26 }
 0x87a   :  { %v1389_v27 = vpop.eup %1388  ;;  %1309 = vmatprep.subr.bf16.mxu0 %v1392_v0 }
 0x87b   :  { %v901_v28 = vmul.f32 %v1389_v27, %v1385_v63 }
 0x87d   :  { %v903_v29 = vpack.c.bf16 %v901_v28, %v901_v28 }
 0x87e   :  { %v1391_v30 = vpop.eup %1390 }
 0x87f   :  { %v902_v31 = vmul.f32 %v1391_v30, %v1387_v20  ;;  %1300 = vmatmul.mubr.msk.bf16.vlgmr.msra.gmra.mrb[12].mxu0 %vm129_vm3, %v903_v29 }
 0x880   :  { %1325 = vmatprep.mubr.msk.bf16.mxu0 %vm1393_vm1, %v1392_v0 }
 0x881   :  { %v904_v32 = vpack.c.bf16 %v902_v31, %v902_v31 }
 0x882   :  { %1310 = vmatpush3.bf16.xpose.msra.mxu0 %v1352_v33 }
 0x883   :  { %1306 = vmatmul.mubr.msk.bf16.vlgmr.msra.gmra.mrb[44].mxu1 %vm129_vm3, %v904_v32  ;;  %1311 = vmatprep.subr.bf16.mxu0 %v1392_v0 }
 0x88a   :  { %1312 = vmatpush3.bf16.xpose.msra.mxu0 %v1353_v34 }
 0x88b   :  { %1313 = vmatprep.subr.bf16.mxu0 %v1392_v0 }
 0x892   :  { %1314 = vmatpush3.bf16.xpose.msra.mxu0 %v1354_v35 }
 0x893   :  { %1315 = vmatprep.subr.bf16.mxu0 %v1392_v0 }
 0x89a   :  { %1316 = vmatpush3.bf16.xpose.msra.mxu0 %v1355_v36 }
 0x89b   :  { %1317 = vmatprep.subr.bf16.mxu0 %v1392_v0 }
 0x8a2   :  { %1318 = vmatpush3.bf16.xpose.msra.mxu0 %v1356_v37 }
 0x8a3   :  { %1319 = vmatprep.subr.bf16.mxu0 %v1392_v0 }
 0x8aa   :  { %1320 = vmatpush3.bf16.xpose.msra.mxu0 %v1357_v38 }
 0x8ab   :  { %1321 = vmatprep.subr.bf16.mxu0 %v1392_v0 }
 0x8b2   :  { %1322 = vmatpush3.bf16.xpose.msra.mxu0 %v1358_v39 }
 0x8b3   :  { %1323 = vmatprep.subr.bf16.mxu0 %v1392_v0 }
 0x8ba   :  { %1324 = vmatpush3.bf16.xpose.msra.mxu0 %v1359_v40 }
 0x952   :  { %v950_v41 = vpop.f32.mrb[12].mxu0 }
 0x953   :  { %v1301_v42 = vpop.f32.mrb[13].mxu0 }
 0x954   :  { %v953_v43 = vpop.f32.mrb[14].mxu0 }
 0x955   :  { %v1302_v44 = vpop.f32.mrb[15].mxu0 }
 0x956   :  { %v1001_v45 = vpop.f32.mrb[44].mxu1 }
 0x957   :  { %v1007_v46 = vpack.c.bf16 %v1001_v45, %v950_v41  ;;  %v1307_v47 = vpop.f32.mrb[45].mxu1 }
 0x958   :  { %v1004_v48 = vpop.f32.mrb[46].mxu1 }
 0x959   :  { %1009 = vrot.lane.b32.xlu0 %v1007_v46, %s1394_s28  ;;  %v1308_v49 = vpop.f32.mrb[47].mxu1 }
 0x9cb   :  { %v1010_v50 = vpop.permute.xlu0 %1009 }
 0x9cc   :  { %1013 = vst.msk [vmem:[#allocation2] sm:$0xff] %vm1012_vm7, %v1010_v50 }
 0x9d3   :  { %v1016_v0 = vld [vmem:[#allocation2] sm:$0xff] }
 0x9d4   :  { %1326 = vmatmul.mubr.bf16.vlgmr.msra.gmra.mrb[16].mxu0 %v1016_v0 }
 0xaa7   :  { %v1115_v53 = vpop.f32.mrb[16].mxu0 }
 0xaa8   :  { %v1122_v55 = vadd.f32 %v1115_v53, %v1014_v51  ;;  %v1327_v56 = vpop.f32.mrb[17].mxu0 }
 0xaa9   :  { %v1118_v57 = vpop.f32.mrb[18].mxu0 }
 0xaaa   :  { %1124 = vst [vmem:[%s1697_s5] sm:$0xff] %v1122_v55  ;;  %v1123_v58 = vadd.f32 %v1118_v57, %v1015_v54  ;;  %v1328_v59 = vpop.f32.mrb[19].mxu0 }
 0xaac   :  { %1125 = vst [vmem:[%s1697_s5 + $0x8] sm:$0xff] %v1123_v58 }

</bundles_post_ra>
